<compile_context>
chip_gen: v7x
topology: tpu7x:2x2x1
jax: 0.10.0
libtpu: 0.0.40
codegen_flags: <defaults>
</compile_context>

<pallas_src>
import jax
import jax.numpy as jnp
from jax import lax
from jax.experimental import pallas as pl
from jax.experimental.pallas import tpu as pltpu

C_PAD = 128            # per-branch channel padding -> lane-dense intermediates
O_PAD = 128            # final output-dim padding  -> lane-dense output store
MXU_DTYPE = jnp.bfloat16


def _const_spec(shape):
    """Full-array block that is identical for every grid step (stays in VMEM)."""
    nd = len(shape)
    return pl.BlockSpec(shape, lambda b, _nd=nd: (0,) * _nd)


# ---------------------------------------------------------------------------
# Fused kernel: one grid step processes NB sequences of length L end-to-end.
# ---------------------------------------------------------------------------
def make_cnn_kernel(layers, L, NB, V):
    NBL = NB * L
    k_max = max(k for (k, _s, _c) in layers)

    def kernel(*refs):
        tok_ref, emb_ref = refs[0], refs[1]
        lw_ref, lb_ref = refs[-3], refs[-2]
        o_ref = refs[-1]

        # ---- embedding gather as one-hot matmul (MXU) ----------------------
        ids = tok_ref[...]                                          # (NBL, 1) int32
        vocab_iota = lax.broadcasted_iota(jnp.int32, (NBL, V), 1)
        onehot = (ids == vocab_iota).astype(MXU_DTYPE)              # (NBL, V)
        embx = jnp.dot(onehot, emb_ref[...],
                       preferred_element_type=jnp.float32)          # (NBL, E) f32

        # ---- shared row-shifted copies of the embedded tile -----------------
        # shifted[j][r, :] == embx[(r + j) % NBL, :]   (XLU sublane roll; the
        # wrapped rows only land on masked window starts).  bf16 cast hoisted:
        # one tiny cast per shifted copy, shared by all conv branches.
        shifted = [embx.astype(MXU_DTYPE)]
        for j in range(1, k_max):
            shifted.append(
                pltpu.roll(embx, shift=NBL - j, axis=0).astype(MXU_DTYPE))

        # Window-start position of each row within its length-L sequence.
        pos = lax.broadcasted_iota(jnp.int32, (NBL, 1), 0) % L

        # ---- conv branches: ONE K=k*E matmul + bias/ReLU + masked max-pool --
        pooled = []
        for i, (k, s, _c) in enumerate(layers):
            w = refs[2 + 2 * i][...]                                # (k*E, C_PAD) bf16
            b = refs[3 + 2 * i][...]                                # (1, C_PAD)  f32

            xcat = jnp.concatenate(shifted[:k], axis=1)             # (NBL, k*E)
            act = jnp.dot(xcat, w, preferred_element_type=jnp.float32)
            act = jnp.maximum(act + b, 0.0)                         # bias + ReLU

            # Valid window starts: whole window inside the sequence + stride.
            valid = pos <= (L - k)
            if s > 1:
                valid = valid & (pos % s == 0)
            # 0.0 is a safe mask value after ReLU (all valid scores are >= 0).
            act = jnp.where(valid, act, 0.0)

            # Per-sequence global max pool: single reshape + vectorized max.
            pooled.append(jnp.max(act.reshape(NB, L, C_PAD), axis=1))  # (NB, C_PAD)

        # ---- channel concat + final linear ---------------------------------
        feat = jnp.concatenate(pooled, axis=1).astype(MXU_DTYPE)    # (NB, nbr*C_PAD)
        out = jnp.dot(feat, lw_ref[...],
                      preferred_element_type=jnp.float32) + lb_ref[...]
        o_ref[...] = out                                            # (NB, 128) lane-dense

    return kernel


# ---------------------------------------------------------------------------
# Parameter prep: transpose / zero-pad to lane-dense 128 columns / bf16 cast
# ---------------------------------------------------------------------------
def _prep_params(params, layers):
    E = params["embedding"].shape[1]
    emb_tab = params["embedding"].astype(MXU_DTYPE)                 # (V, E)

    conv_w, conv_b = [], []
    for i, (k, _s, c) in enumerate(layers):
        wt = jnp.zeros((k * E, C_PAD), MXU_DTYPE)
        wt = wt.at[:, :c].set(params["conv_w"][i].T.astype(MXU_DTYPE))
        bb = jnp.zeros((1, C_PAD), jnp.float32)
        bb = bb.at[0, :c].set(params["conv_b"][i])
        conv_w.append(wt)
        conv_b.append(bb)

    out_dim = params["lin_w"].shape[0]
    lw = jnp.zeros((len(layers) * C_PAD, O_PAD), MXU_DTYPE)
    col = 0
    for i, (_k, _s, c) in enumerate(layers):
        blk = params["lin_w"][:, col:col + c].T.astype(MXU_DTYPE)   # (c, out_dim)
        lw = lw.at[i * C_PAD:i * C_PAD + c, :out_dim].set(blk)
        col += c
    lb = jnp.zeros((1, O_PAD), jnp.float32)
    lb = lb.at[0, :out_dim].set(params["lin_b"])
    return emb_tab, conv_w, conv_b, lw, lb


# ---------------------------------------------------------------------------
# Batch-tile heuristic: grid of <= 2 steps, sublane-aligned, bounded rows.
# ---------------------------------------------------------------------------
def _default_batch_tile(N, L):
    nb = -(-N // 2)                                  # ceil(N/2): <= 2 grid steps
    nb = -(-nb // 8) * 8                             # sublane multiple
    cap = max(8, (4096 // max(L, 1)) // 8 * 8)       # bound NB*L rows per step
    return max(8, min(nb, cap))


# ---------------------------------------------------------------------------
# Forward wrapper (single pallas_call, grid over batch tiles)
# ---------------------------------------------------------------------------
def cnn_forward(tokens, params, layers, *, batch_tile=None):
    N, L = tokens.shape
    V, E = params["embedding"].shape
    out_dim = params["lin_w"].shape[0]

    NB = _default_batch_tile(N, L) if batch_tile is None else batch_tile
    n_blocks = -(-N // NB)
    if n_blocks > 1 and n_blocks % 2:
        n_blocks += 1                                # even step count -> both v7x TCs busy
    N_pad = n_blocks * NB
    if N_pad != N:                                   # pad batch with token 0
        pad = jnp.zeros((N_pad - N, L), tokens.dtype)
        tokens = jnp.concatenate([tokens, pad], axis=0)
    tok_flat = tokens.astype(jnp.int32).reshape(N_pad * L, 1)

    emb_tab, conv_w, conv_b, lw, lb = _prep_params(params, layers)

    NBL = NB * L
    in_specs = [pl.BlockSpec((NBL, 1), lambda b: (b, 0)),
                _const_spec((V, E))]
    operands = [tok_flat, emb_tab]
    for i, (k, _s, _c) in enumerate(layers):
        in_specs += [_const_spec((k * E, C_PAD)), _const_spec((1, C_PAD))]
        operands += [conv_w[i], conv_b[i]]
    in_specs += [_const_spec((len(layers) * C_PAD, O_PAD)), _const_spec((1, O_PAD))]
    operands += [lw, lb]

    # Advisory cost estimate for the XLA scheduler (matmul flops + real bytes).
    flops_step = 2 * NBL * V * E
    for (k, _s, _c) in layers:
        flops_step += 2 * NBL * (k * E) * C_PAD
    flops_step += 2 * NB * (len(layers) * C_PAD) * O_PAD
    bytes_accessed = (
        N_pad * L * 4 + V * E * 2
        + sum(k * E * C_PAD * 2 + C_PAD * 4 for (k, _s, _c) in layers)
        + len(layers) * C_PAD * O_PAD * 2 + O_PAD * 4
        + N_pad * O_PAD * 4)
    cost = pl.CostEstimate(flops=int(flops_step * n_blocks),
                           transcendentals=0,
                           bytes_accessed=int(bytes_accessed))

    out = pl.pallas_call(
        make_cnn_kernel(layers, L, NB, V),
        grid=(n_blocks,),
        in_specs=in_specs,
        out_specs=pl.BlockSpec((NB, O_PAD), lambda b: (b, 0)),
        out_shape=jax.ShapeDtypeStruct((N_pad, O_PAD), jnp.float32),
        compiler_params=pltpu.CompilerParams(
            dimension_semantics=("parallel",),        # batch tiles across TCs (v7x)
            vmem_limit_bytes=16 * 1024 * 1024,
        ),
        cost_estimate=cost,
    )(*operands)
    return out[:N, :out_dim]                                        # drop lane/batch padding


# ---------------------------------------------------------------------------
# Pure-JAX reference (mirrors the kernel's bf16 operand rounding)
# ---------------------------------------------------------------------------
def cnn_reference(tokens, params, layers, mxu_dtype=MXU_DTYPE):
    q = lambda x: x.astype(mxu_dtype).astype(jnp.float32)
    emb = jnp.take(q(params["embedding"]), tokens, axis=0)          # (N, L, E)
    N, L, _ = emb.shape
    pooled = []
    for i, (k, s, _c) in enumerate(layers):
        T = (L - k) // s + 1
        idx = jnp.arange(T)[:, None] * s + jnp.arange(k)[None, :]   # (T, k)
        patches = emb[:, idx, :].reshape(N, T, -1)                  # (N, T, k*E)
        scores = jnp.einsum("ntf,cf->ntc", patches, q(params["conv_w"][i]))
        scores = jax.nn.relu(scores + params["conv_b"][i])
        pooled.append(jnp.max(scores, axis=1))                      # (N, c)
    feat = q(jnp.concatenate(pooled, axis=1))
    return feat @ q(params["lin_w"]).T + params["lin_b"]


# ---------------------------------------------------------------------------
# Deterministic parameter init (shapes follow the PyTorch module's __init__)
# ---------------------------------------------------------------------------
def init_params(key, layers, embedding_dim, vocab_dim, out_dim):
    keys = jax.random.split(key, 2 * len(layers) + 3)
    params = {}
    params["embedding"] = jax.random.normal(
        keys[0], (vocab_dim, embedding_dim), jnp.float32)
    conv_w, conv_b = [], []
    for i, (k, _s, c) in enumerate(layers):
        fan_in = 1 * k * embedding_dim
        bound = 1.0 / float(fan_in) ** 0.5
        # PyTorch conv weight (C, 1, k, E) flattened to (C, k*E)
        conv_w.append(jax.random.uniform(keys[1 + 2 * i], (c, k * embedding_dim),
                                         jnp.float32, -bound, bound))
        conv_b.append(jax.random.uniform(keys[2 + 2 * i], (c,),
                                         jnp.float32, -bound, bound))
    params["conv_w"] = conv_w
    params["conv_b"] = conv_b
    F = sum(l[2] for l in layers)
    bound = 1.0 / float(F) ** 0.5
    params["lin_w"] = jax.random.uniform(keys[-2], (out_dim, F), jnp.float32, -bound, bound)
    params["lin_b"] = jax.random.uniform(keys[-1], (out_dim,), jnp.float32, -bound, bound)
    return params


if __name__ == "__main__":
    # layers[i] = (kernel_size along seq, stride, out_channels)
    layers = [(3, 1, 8), (4, 2, 8)]
    embedding_dim = 16
    vocab_dim = 50
    out_dim = 5
    N, L = 16, 16

    key = jax.random.PRNGKey(0)
    pkey, tkey = jax.random.split(key)
    params = init_params(pkey, layers, embedding_dim, vocab_dim, out_dim)
    tokens = jax.random.randint(tkey, (N, L), 0, vocab_dim, dtype=jnp.int32)

    fwd = jax.jit(lambda t, p: cnn_forward(t, p, layers))
    out = jax.block_until_ready(fwd(tokens, params))
    assert out.shape == (N, out_dim), out.shape
    assert out.dtype == jnp.float32, out.dtype

    ref = cnn_reference(tokens, params, layers)
    err = float(jnp.max(jnp.abs(out - ref)))
    assert err < 2e-2, f"max abs error vs reference: {err}"
    print("KERNEL_OK")
</pallas_src>

<mosaic_0001>
module attributes {stable_mosaic.version = 11 : i64} {
  func.func @kernel(%arg0: i32, %arg1: memref<128x1xi32, #tpu.memory_space<vmem>>, %arg2: memref<50x16xbf16, #tpu.memory_space<vmem>>, %arg3: memref<48x128xbf16, #tpu.memory_space<vmem>>, %arg4: memref<1x128xf32, #tpu.memory_space<vmem>>, %arg5: memref<64x128xbf16, #tpu.memory_space<vmem>>, %arg6: memref<1x128xf32, #tpu.memory_space<vmem>>, %arg7: memref<256x128xbf16, #tpu.memory_space<vmem>>, %arg8: memref<1x128xf32, #tpu.memory_space<vmem>>, %arg9: memref<8x128xf32, #tpu.memory_space<vmem>>) attributes {dimension_semantics = [#tpu.dimension_semantics<parallel>], iteration_bounds = array<i64: 2>, scalar_prefetch = 0 : i64, scratch_operands = 0 : i64, tpu.core_type = #tpu.core_type<tc>, window_params = [{transform_indices = @transform_0, window_bounds = array<i64: 128, 1>}, {pipeline_mode = #tpu.pipeline_mode<synchronous>, transform_indices = @transform_1, window_bounds = array<i64: 50, 16>}, {pipeline_mode = #tpu.pipeline_mode<synchronous>, transform_indices = @transform_2, window_bounds = array<i64: 48, 128>}, {pipeline_mode = #tpu.pipeline_mode<synchronous>, transform_indices = @transform_3, window_bounds = array<i64: 1, 128>}, {pipeline_mode = #tpu.pipeline_mode<synchronous>, transform_indices = @transform_4, window_bounds = array<i64: 64, 128>}, {pipeline_mode = #tpu.pipeline_mode<synchronous>, transform_indices = @transform_5, window_bounds = array<i64: 1, 128>}, {pipeline_mode = #tpu.pipeline_mode<synchronous>, transform_indices = @transform_6, window_bounds = array<i64: 256, 128>}, {pipeline_mode = #tpu.pipeline_mode<synchronous>, transform_indices = @transform_7, window_bounds = array<i64: 1, 128>}, {transform_indices = @transform_8, window_bounds = array<i64: 8, 128>}]} {
    %c0 = arith.constant 0 : index
    %c0_0 = arith.constant 0 : index
    %0 = vector.load %arg1[%c0, %c0_0] : memref<128x1xi32, #tpu.memory_space<vmem>>, vector<128x1xi32>
    %1 = tpu.iota {dimensions = array<i32: 1>} : vector<128x50xi32>
    %2 = vector.broadcast %0 : vector<128x1xi32> to vector<128x50xi32>
    %3 = arith.cmpi eq, %2, %1 : vector<128x50xi32>
    %4 = arith.extui %3 : vector<128x50xi1> to vector<128x50xi32>
    %5 = arith.sitofp %4 : vector<128x50xi32> to vector<128x50xf32>
    %6 = arith.truncf %5 : vector<128x50xf32> to vector<128x50xbf16>
    %c0_1 = arith.constant 0 : index
    %c0_2 = arith.constant 0 : index
    %7 = vector.load %arg2[%c0_1, %c0_2] : memref<50x16xbf16, #tpu.memory_space<vmem>>, vector<50x16xbf16>
    %cst = arith.constant dense<0.000000e+00> : vector<128x16xf32>
    %8 = tpu.matmul %6, %7, %cst {dimension_numbers = #tpu.dot_dimension_numbers<[1], [0], [0], [1], [0, 0, 1, 1], [], []>} : vector<128x50xbf16>, vector<50x16xbf16>, vector<128x16xf32> -> vector<128x16xf32>
    %9 = arith.truncf %8 : vector<128x16xf32> to vector<128x16xbf16>
    %c127_i32 = arith.constant 127 : i32
    %10 = tpu.dynamic_rotate %8 by %c127_i32 dim 0 : vector<128x16xf32>, i32 -> vector<128x16xf32>
    %11 = arith.truncf %10 : vector<128x16xf32> to vector<128x16xbf16>
    %c126_i32 = arith.constant 126 : i32
    %12 = tpu.dynamic_rotate %8 by %c126_i32 dim 0 : vector<128x16xf32>, i32 -> vector<128x16xf32>
    %13 = arith.truncf %12 : vector<128x16xf32> to vector<128x16xbf16>
    %c125_i32 = arith.constant 125 : i32
    %14 = tpu.dynamic_rotate %8 by %c125_i32 dim 0 : vector<128x16xf32>, i32 -> vector<128x16xf32>
    %15 = arith.truncf %14 : vector<128x16xf32> to vector<128x16xbf16>
    %16 = tpu.iota {dimensions = array<i32: 0>} : vector<128x1xi32>
    %c16_i32 = arith.constant 16 : i32
    %c0_i32 = arith.constant 0 : i32
    %17 = arith.cmpi eq, %c16_i32, %c0_i32 : i32
    %c1_i32 = arith.constant 1 : i32
    %18 = arith.select %17, %c1_i32, %c16_i32 : i32
    %19 = vector.broadcast %18 : i32 to vector<128x1xi32>
    %20 = arith.remsi %16, %19 : vector<128x1xi32>
    %c0_i32_3 = arith.constant 0 : i32
    %21 = vector.broadcast %c0_i32_3 : i32 to vector<128x1xi32>
    %22 = arith.cmpi ne, %20, %21 : vector<128x1xi32>
    %c0_i32_4 = arith.constant 0 : i32
    %23 = vector.broadcast %c0_i32_4 : i32 to vector<128x1xi32>
    %24 = arith.cmpi slt, %20, %23 : vector<128x1xi32>
    %c0_i32_5 = arith.constant 0 : i32
    %25 = arith.cmpi slt, %18, %c0_i32_5 : i32
    %26 = vector.broadcast %25 : i1 to vector<128x1xi1>
    %27 = vector.broadcast %26 : vector<128x1xi1> to vector<128x1xi1>
    %28 = arith.xori %24, %27 : vector<128x1xi1>
    %29 = arith.andi %28, %22 : vector<128x1xi1>
    %30 = vector.broadcast %18 : i32 to vector<128x1xi32>
    %31 = arith.addi %20, %30 : vector<128x1xi32>
    %32 = arith.select %29, %31, %20 : vector<128x1xi1>, vector<128x1xi32>
    %c0_6 = arith.constant 0 : index
    %c0_7 = arith.constant 0 : index
    %33 = vector.load %arg3[%c0_6, %c0_7] : memref<48x128xbf16, #tpu.memory_space<vmem>>, vector<48x128xbf16>
    %c0_8 = arith.constant 0 : index
    %c0_9 = arith.constant 0 : index
    %34 = vector.load %arg4[%c0_8, %c0_9] : memref<1x128xf32, #tpu.memory_space<vmem>>, vector<1x128xf32>
    %35 = tpu.concatenate %9, %11, %13 in 1 : vector<128x16xbf16>, vector<128x16xbf16>, vector<128x16xbf16> -> vector<128x48xbf16>
    %cst_10 = arith.constant dense<0.000000e+00> : vector<128x128xf32>
    %36 = tpu.matmul %35, %33, %cst_10 {dimension_numbers = #tpu.dot_dimension_numbers<[1], [0], [0], [1], [0, 0, 1, 1], [], []>} : vector<128x48xbf16>, vector<48x128xbf16>, vector<128x128xf32> -> vector<128x128xf32>
    %37 = vector.broadcast %34 : vector<1x128xf32> to vector<128x128xf32>
    %38 = arith.addf %36, %37 : vector<128x128xf32>
    %cst_11 = arith.constant 0.000000e+00 : f32
    %39 = vector.broadcast %cst_11 : f32 to vector<128x128xf32>
    %40 = arith.maximumf %38, %39 : vector<128x128xf32>
    %c13_i32 = arith.constant 13 : i32
    %41 = vector.broadcast %c13_i32 : i32 to vector<128x1xi32>
    %42 = arith.cmpi sle, %32, %41 : vector<128x1xi32>
    %cst_12 = arith.constant 0.000000e+00 : f32
    %43 = vector.shape_cast %42 : vector<128x1xi1> to vector<128x1xi1>
    %44 = vector.broadcast %43 : vector<128x1xi1> to vector<128x128xi1>
    %45 = vector.broadcast %cst_12 : f32 to vector<128x128xf32>
    %46 = arith.select %44, %40, %45 : vector<128x128xi1>, vector<128x128xf32>
    %47 = vector.shape_cast %46 : vector<128x128xf32> to vector<8x16x128xf32>
    %cst_13 = arith.constant dense<0xFF800000> : vector<8x128xf32>
    %48 = vector.multi_reduction <maximumf>, %47, %cst_13 [1] : vector<8x16x128xf32> to vector<8x128xf32>
    %c0_14 = arith.constant 0 : index
    %c0_15 = arith.constant 0 : index
    %49 = vector.load %arg5[%c0_14, %c0_15] : memref<64x128xbf16, #tpu.memory_space<vmem>>, vector<64x128xbf16>
    %c0_16 = arith.constant 0 : index
    %c0_17 = arith.constant 0 : index
    %50 = vector.load %arg6[%c0_16, %c0_17] : memref<1x128xf32, #tpu.memory_space<vmem>>, vector<1x128xf32>
    %51 = tpu.concatenate %9, %11, %13, %15 in 1 : vector<128x16xbf16>, vector<128x16xbf16>, vector<128x16xbf16>, vector<128x16xbf16> -> vector<128x64xbf16>
    %cst_18 = arith.constant dense<0.000000e+00> : vector<128x128xf32>
    %52 = tpu.matmul %51, %49, %cst_18 {dimension_numbers = #tpu.dot_dimension_numbers<[1], [0], [0], [1], [0, 0, 1, 1], [], []>} : vector<128x64xbf16>, vector<64x128xbf16>, vector<128x128xf32> -> vector<128x128xf32>
    %53 = vector.broadcast %50 : vector<1x128xf32> to vector<128x128xf32>
    %54 = arith.addf %52, %53 : vector<128x128xf32>
    %cst_19 = arith.constant 0.000000e+00 : f32
    %55 = vector.broadcast %cst_19 : f32 to vector<128x128xf32>
    %56 = arith.maximumf %54, %55 : vector<128x128xf32>
    %c12_i32 = arith.constant 12 : i32
    %57 = vector.broadcast %c12_i32 : i32 to vector<128x1xi32>
    %58 = arith.cmpi sle, %32, %57 : vector<128x1xi32>
    %c2_i32 = arith.constant 2 : i32
    %c0_i32_20 = arith.constant 0 : i32
    %59 = arith.cmpi eq, %c2_i32, %c0_i32_20 : i32
    %c1_i32_21 = arith.constant 1 : i32
    %60 = arith.select %59, %c1_i32_21, %c2_i32 : i32
    %61 = vector.broadcast %60 : i32 to vector<128x1xi32>
    %62 = arith.remsi %32, %61 : vector<128x1xi32>
    %c0_i32_22 = arith.constant 0 : i32
    %63 = vector.broadcast %c0_i32_22 : i32 to vector<128x1xi32>
    %64 = arith.cmpi ne, %62, %63 : vector<128x1xi32>
    %c0_i32_23 = arith.constant 0 : i32
    %65 = vector.broadcast %c0_i32_23 : i32 to vector<128x1xi32>
    %66 = arith.cmpi slt, %62, %65 : vector<128x1xi32>
    %c0_i32_24 = arith.constant 0 : i32
    %67 = arith.cmpi slt, %60, %c0_i32_24 : i32
    %68 = vector.broadcast %67 : i1 to vector<128x1xi1>
    %69 = vector.broadcast %68 : vector<128x1xi1> to vector<128x1xi1>
    %70 = arith.xori %66, %69 : vector<128x1xi1>
    %71 = arith.andi %70, %64 : vector<128x1xi1>
    %72 = vector.broadcast %60 : i32 to vector<128x1xi32>
    %73 = arith.addi %62, %72 : vector<128x1xi32>
    %74 = arith.select %71, %73, %62 : vector<128x1xi1>, vector<128x1xi32>
    %c0_i32_25 = arith.constant 0 : i32
    %75 = vector.broadcast %c0_i32_25 : i32 to vector<128x1xi32>
    %76 = arith.cmpi eq, %74, %75 : vector<128x1xi32>
    %77 = arith.andi %58, %76 : vector<128x1xi1>
    %cst_26 = arith.constant 0.000000e+00 : f32
    %78 = vector.shape_cast %77 : vector<128x1xi1> to vector<128x1xi1>
    %79 = vector.broadcast %78 : vector<128x1xi1> to vector<128x128xi1>
    %80 = vector.broadcast %cst_26 : f32 to vector<128x128xf32>
    %81 = arith.select %79, %56, %80 : vector<128x128xi1>, vector<128x128xf32>
    %82 = vector.shape_cast %81 : vector<128x128xf32> to vector<8x16x128xf32>
    %cst_27 = arith.constant dense<0xFF800000> : vector<8x128xf32>
    %83 = vector.multi_reduction <maximumf>, %82, %cst_27 [1] : vector<8x16x128xf32> to vector<8x128xf32>
    %84 = tpu.concatenate %48, %83 in 1 : vector<8x128xf32>, vector<8x128xf32> -> vector<8x256xf32>
    %85 = arith.truncf %84 : vector<8x256xf32> to vector<8x256xbf16>
    %c0_28 = arith.constant 0 : index
    %c0_29 = arith.constant 0 : index
    %86 = vector.load %arg7[%c0_28, %c0_29] : memref<256x128xbf16, #tpu.memory_space<vmem>>, vector<256x128xbf16>
    %cst_30 = arith.constant dense<0.000000e+00> : vector<8x128xf32>
    %87 = tpu.matmul %85, %86, %cst_30 {dimension_numbers = #tpu.dot_dimension_numbers<[1], [0], [0], [1], [0, 0, 1, 1], [], []>} : vector<8x256xbf16>, vector<256x128xbf16>, vector<8x128xf32> -> vector<8x128xf32>
    %c0_31 = arith.constant 0 : index
    %c0_32 = arith.constant 0 : index
    %88 = vector.load %arg8[%c0_31, %c0_32] : memref<1x128xf32, #tpu.memory_space<vmem>>, vector<1x128xf32>
    %89 = vector.broadcast %88 : vector<1x128xf32> to vector<8x128xf32>
    %90 = arith.addf %87, %89 : vector<8x128xf32>
    %c0_33 = arith.constant 0 : index
    %c0_34 = arith.constant 0 : index
    %91 = vector.load %arg9[%c0_33, %c0_34] : memref<8x128xf32, #tpu.memory_space<vmem>>, vector<8x128xf32>
    tpu.vector_store %arg9[%c0_33, %c0_34], %90 {strides = array<i32>} : memref<8x128xf32, #tpu.memory_space<vmem>>, vector<8x128xf32>,
    return
  }
  func.func @transform_0(%arg0: i32) -> (i32, i32) {
    %c0_i32 = arith.constant 0 : i32
    %c0_i32_0 = arith.constant 0 : i32
    return %arg0, %c0_i32 : i32, i32
  }
  func.func @transform_1(%arg0: i32) -> (i32, i32) {
    %c0_i32 = arith.constant 0 : i32
    %c0_i32_0 = arith.constant 0 : i32
    %c0_i32_1 = arith.constant 0 : i32
    return %c0_i32, %c0_i32_0 : i32, i32
  }
  func.func @transform_2(%arg0: i32) -> (i32, i32) {
    %c0_i32 = arith.constant 0 : i32
    %c0_i32_0 = arith.constant 0 : i32
    %c0_i32_1 = arith.constant 0 : i32
    return %c0_i32, %c0_i32_0 : i32, i32
  }
  func.func @transform_3(%arg0: i32) -> (i32, i32) {
    %c0_i32 = arith.constant 0 : i32
    %c0_i32_0 = arith.constant 0 : i32
    %c0_i32_1 = arith.constant 0 : i32
    return %c0_i32, %c0_i32_0 : i32, i32
  }
  func.func @transform_4(%arg0: i32) -> (i32, i32) {
    %c0_i32 = arith.constant 0 : i32
    %c0_i32_0 = arith.constant 0 : i32
    %c0_i32_1 = arith.constant 0 : i32
    return %c0_i32, %c0_i32_0 : i32, i32
  }
  func.func @transform_5(%arg0: i32) -> (i32, i32) {
    %c0_i32 = arith.constant 0 : i32
    %c0_i32_0 = arith.constant 0 : i32
    %c0_i32_1 = arith.constant 0 : i32
    return %c0_i32, %c0_i32_0 : i32, i32
  }
  func.func @transform_6(%arg0: i32) -> (i32, i32) {
    %c0_i32 = arith.constant 0 : i32
    %c0_i32_0 = arith.constant 0 : i32
    %c0_i32_1 = arith.constant 0 : i32
    return %c0_i32, %c0_i32_0 : i32, i32
  }
  func.func @transform_7(%arg0: i32) -> (i32, i32) {
    %c0_i32 = arith.constant 0 : i32
    %c0_i32_0 = arith.constant 0 : i32
    %c0_i32_1 = arith.constant 0 : i32
    return %c0_i32, %c0_i32_0 : i32, i32
  }
  func.func @transform_8(%arg0: i32) -> (i32, i32) {
    %c0_i32 = arith.constant 0 : i32
    %c0_i32_0 = arith.constant 0 : i32
    return %arg0, %c0_i32 : i32, i32
  }
}

</mosaic_0001>

<bundles_post_ra>
// kernel: _lambda_.1
= control target key start
LH: loop header
LB: loop body
LE: loop exit
PB: predicated region body
PF: predicated region fallthrough
CT: control target
= control target key end

     0   :  { %s2425_s27 = smov 0   ;;  %s3160_s0 = inlined_call_operand.vmem [shape: s32[256,1], index: 0, kind: input, shape index: {}]   ;;  %s3161_s1 = inlined_call_operand.vmem [shape: bf16[50,16], index: 1, kind: input, shape index: {}]   ;;  %s3162_s2 = inlined_call_operand.vmem [shape: bf16[48,128], index: 2, kind: input, shape index: {}]   ;;  %s3163_s3 = inlined_call_operand.vmem [shape: f32[1,128], index: 3, kind: input, shape index: {}]   ;;  %s3164_s4 = inlined_call_operand.vmem [shape: bf16[64,128], index: 4, kind: input, shape index: {}]   ;;  %s3165_s5 = inlined_call_operand.vmem [shape: f32[1,128], index: 5, kind: input, shape index: {}]   ;;  %s3166_s6 = inlined_call_operand.vmem [shape: bf16[256,128], index: 6, kind: input, shape index: {}]   ;;  %s3167_s7 = inlined_call_operand.vmem [shape: f32[1,128], index: 7, kind: input, shape index: {}]   ;;  %s3168_s8 = inlined_call_operand.vmem [shape: f32[16,128], index: 8, kind: output, shape index: {}]  }
   0x1 LB: > { %s2431_s28 = sadd.s32 4294967295, %s2373_s27   ;;  %p2121_p0 = scmp.ge.s32.totalorder %s2373_s27, 1  ;;  %s2373_s27 = sphi %s2425_s27, %s18_s27  }
   0x2   : > { %p263_p1 = scmp.lt.s32.totalorder %s2373_s27, 3 }
   0x4   : > { %p264_p2 = pnand %p2121_p0, %p263_p1 }
   0x5   : > { %s2122_s29 = sshll.u32 (!%p264_p2), %s2431_s28, 4  ;;  %v2375_v0 = vmov (!%p264_p2), 0   ;;  %v2340_v1 = vld [vmem:[%s3161_s1] sm:$0xff] (!%p264_p2)   ;;  %v2341_v2 = vld [vmem:[%s3161_s1 + $0x8] sm:$0xff] (!%p264_p2)   ;;  %v2342_v9 = vld [vmem:[%s3161_s1 + $0x10] sm:$0xff] (!%p264_p2)   ;;  %vm482_vm0 = vcmask (!%p264_p2), 1040384   ;;  %v323_v22 = vlaneseq (!%p264_p2) }
   0x6   : > { %267 = sbr.rel (%p264_p2) target bundleno = 1016 (0x3f8), region = 52  ;;  %2339 = vset.pattern.permute.xlu1 (!%p264_p2), %v2375_v0  ;;  %2338 = vset.pattern.permute.xlu0 (!%p264_p2), %v2375_v0  ;;  %p297_p3 = scmp.lt.s32.totalorder (!%p264_p2), %s2122_s29, 31  ;;  %v2343_v10 = vld [vmem:[%s3161_s1 + $0x18] ss:$0 sps:$4 sm:$0x11] (!%p264_p2)   ;;  %vm457_vm5 = vcmask (!%p264_p2), 408576  }
   0x7   : > { %2254 = vmatprep.subr.bf16.mxu0 (!%p264_p2), %v2340_v1  ;;  %v484_v13 = vsel (!%p264_p2), %vm482_vm0, %v2343_v10, 0  ;;  %v2470_v23 = vand.u32 (!%p264_p2), 127, %v323_v22  ;;  %v2376_v28 = vmov (!%p264_p2), 0.0   ;;  %s2377_s30 = smov (!%p264_p2), 16   ;;  %s2378_s9 = smov (!%p264_p2), 32  }
   0x8   : > { %2255 = vmatpush3.bf16.msra.mxu0 (!%p264_p2), %v2340_v1  ;;  %v2344_v1 = vld [vmem:[%s3162_s2] sm:$0xff] (!%p264_p2)   ;;  %s2379_s10 = smov (!%p264_p2), 48   ;;  %p302_p4 = scmp.lt.s32.totalorder (!%p264_p2), %s2431_s28, 1 }
   0x9   : > { %2256 = vmatprep.subr.bf16.mxu0 (!%p264_p2), %v2341_v2  ;;  %2278 = vmatprep.subr.bf16.mxu1 (!%p264_p2), %v2344_v1 }
   0xa   : > { %2279 = vmatpush3.bf16.msra.mxu1 (!%p264_p2), %v2344_v1 }
   0xc   : > { %2257 = vmatpush3.bf16.msra.mxu0 (!%p264_p2), %v2341_v2  ;;  %v2345_v2 = vld [vmem:[%s3162_s2 + $0x8] sm:$0xff] (!%p264_p2)  }
   0xd   : > { %s3201_s29 = smov (!%p297_p3, %s2122_s29), 31  ;;  %2258 = vmatprep.subr.bf16.mxu0 %v2342_v9  ;;  %2280 = vmatprep.subr.bf16.mxu1 %v2345_v2  ;;  %s3203_s28 = smov (!%p302_p4, %s2431_s28), 1 }
   0xe   : > { %s2123_s12 = sshll.u32 %s3201_s29, 3  ;;  %2281 = vmatpush3.bf16.msra.mxu1 %v2345_v2  ;;  %s2124_s13 = sshll.u32 %s3203_s28, 3 }
   0xf   : > { %s2445_s15 = scalar_lea.vmem %s3160_s0, %s2123_s12  ;;  %s305_s18 = scalar_lea.vmem %s3168_s8, %s2124_s13 }
  0x10   : > { %v309_v3 = vld [vmem:[%s2445_s15 + $0x10] sm:$0xff]  ;;  %v307_v4 = vld [vmem:[%s2445_s15] sm:$0xff]  ;;  %v310_v5 = vld [vmem:[%s2445_s15 + $0x18] sm:$0xff]  ;;  %2259 = vmatpush3.bf16.msra.mxu0 %v2342_v9 }
  0x11   : > { %332 = vperm.xlu1 %2339, %v309_v3   ;;  %326 = vperm.xlu0 %2338, %v307_v4   ;;  %v308_v6 = vld [vmem:[%s2445_s15 + $0x8] sm:$0xff]  ;;  %v311_v8 = vld [vmem:[%s2445_s15 + $0x20] sm:$0xff]  ;;  %v314_v11 = vld [vmem:[%s2445_s15 + $0x38] sm:$0xff]  ;;  %v2503_v3 = vshrl.u32 %v323_v22, 7 }
  0x12   : > { %v312_v7 = vld [vmem:[%s2445_s15 + $0x28] sm:$0xff]  ;;  %v313_v12 = vld [vmem:[%s2445_s15 + $0x30] sm:$0xff]  ;;  %2324 = vmatprep.subr.msk.bf16.mxu0 %vm482_vm0, %v2343_v10  ;;  %v315_v15 = vld [vmem:[%s2445_s15 + $0x40] sm:$0xff] }
  0x13   : > { %v316_v14 = vld [vmem:[%s2445_s15 + $0x48] sm:$0xff]  ;;  %v318_v16 = vld [vmem:[%s2445_s15 + $0x58] sm:$0xff]  ;;  %v317_v17 = vld [vmem:[%s2445_s15 + $0x50] sm:$0xff] }
  0x14   : > { %2261 = vmatpush3.bf16.msra.mxu0 %v484_v13  ;;  %v320_v18 = vld [vmem:[%s2445_s15 + $0x68] sm:$0xff]  ;;  %v319_v19 = vld [vmem:[%s2445_s15 + $0x60] sm:$0xff]  ;;  %v322_v20 = vld [vmem:[%s2445_s15 + $0x78] sm:$0xff] }
  0x15   : > { %335 = vperm.xlu1 %2339, %v310_v5   ;;  %329 = vperm.xlu0 %2338, %v308_v6   ;;  %v321_v21 = vld [vmem:[%s2445_s15 + $0x70] sm:$0xff] }
  0x19   : > { %341 = vperm.xlu1 %2339, %v312_v7   ;;  %338 = vperm.xlu0 %2338, %v311_v8  }
  0x1d   : > { %347 = vperm.xlu1 %2339, %v314_v11   ;;  %344 = vperm.xlu0 %2338, %v313_v12  }
  0x21   : > { %353 = vperm.xlu1 %2339, %v316_v14   ;;  %350 = vperm.xlu0 %2338, %v315_v15  }
  0x25   : > { %359 = vperm.xlu1 %2339, %v318_v16   ;;  %356 = vperm.xlu0 %2338, %v317_v17   ;;  %v2346_v17 = vld [vmem:[%s3162_s2 + $0x10] sm:$0xff]  }
  0x26   : > { %2282 = vmatprep.subr.bf16.mxu1 %v2346_v17 }
  0x27   : > { %2283 = vmatpush3.bf16.msra.mxu1 %v2346_v17 }
  0x29   : > { %365 = vperm.xlu1 %2339, %v320_v18   ;;  %362 = vperm.xlu0 %2338, %v319_v19  }
  0x2d   : > { %371 = vperm.xlu1 %2339, %v322_v20   ;;  %368 = vperm.xlu0 %2338, %v321_v21  }
  0x90   : > { %v333_v24 = vpop.permute.xlu1 %332  ;;  %v327_v25 = vpop.permute.xlu0 %326 }
  0x91   : > { %vm375_vm1 = vcmp.eq.s32.totalorder %v333_v24, %v2470_v23  ;;  %vm373_vm2 = vcmp.eq.s32.totalorder %v327_v25, %v2470_v23 }
  0x92   : > { %v2127_v29 = vsel %vm375_vm1, 1.0, %v2376_v28  ;;  %v2125_v30 = vsel %vm373_vm2, 1.0, %v2376_v28  ;;  %vm609_vm2 = vcmp.lt.s32.totalorder %v2503_v3, 7 }
  0x94   : > { %v336_v26 = vpop.permute.xlu1 %335  ;;  %v330_v27 = vpop.permute.xlu0 %329 }
  0x95   : > { %vm376_vm3 = vcmp.eq.s32.totalorder %v336_v26, %v2470_v23  ;;  %vm374_vm4 = vcmp.eq.s32.totalorder %v330_v27, %v2470_v23 }
  0x96   : > { %v2128_v31 = vsel %vm376_vm3, 1.0, %v2376_v28  ;;  %v2126_v32 = vsel %vm374_vm4, 1.0, %v2376_v28  ;;  %vm650_vm3 = vcmp.lt.s32.totalorder %v2503_v3, 6  ;;  %vm691_vm4 = vcmp.lt.s32.totalorder %v2503_v3, 5 }
  0x97   : > { %v422_v33 = vpack.c.bf16 %v2128_v31, %v2127_v29  ;;  %v421_v34 = vpack.c.bf16 %v2126_v32, %v2125_v30 }
  0x98   : > { %v342_v35 = vpop.permute.xlu1 %341  ;;  %v339_v36 = vpop.permute.xlu0 %338 }
  0x99   : > { %vm378_vm6 = vcmp.eq.s32.totalorder %v342_v35, %v2470_v23  ;;  %vm377_vm7 = vcmp.eq.s32.totalorder %v339_v36, %v2470_v23  ;;  %2262 = vmatprep.mubr.msk.bf16.mxu0 %vm457_vm5, %v421_v34  ;;  %v2572_v34 = vld [vmem:[%s3164_s4] sm:$0xff]  }
  0x9a   : > { %v2130_v37 = vsel %vm378_vm6, 1.0, %v2376_v28  ;;  %v2129_v38 = vsel %vm377_vm7, 1.0, %v2376_v28  ;;  %2263 = vmatmul.mubr.msk.bf16.vlgmr.msra.gmra.mrb[0].mxu0 %vm457_vm5, %v422_v33  ;;  %2300 = vmatprep.subr.bf16.mxu1 %v2572_v34  ;;  %vm1003_vm6 = vcmask 261120   ;;  %vm1044_vm7 = vcmask 392192  }
  0x9b   : > { %v423_v39 = vpack.c.bf16 %v2130_v37, %v2129_v38 }
  0x9c   : > { %v348_v40 = vpop.permute.xlu1 %347  ;;  %v345_v41 = vpop.permute.xlu0 %344 }
  0x9d   : > { %vm380_vm8 = vcmp.eq.s32.totalorder %v348_v40, %v2470_v23  ;;  %vm379_vm9 = vcmp.eq.s32.totalorder %v345_v41, %v2470_v23  ;;  %2266 = vmatprep.mubr.msk.bf16.mxu0 %vm457_vm5, %v423_v39 }
  0x9e   : > { %v2132_v42 = vsel %vm380_vm8, 1.0, %v2376_v28  ;;  %v2131_v43 = vsel %vm379_vm9, 1.0, %v2376_v28  ;;  %vm1373_vm8 = vcmask 523264  }
  0x9f   : > { %v424_v44 = vpack.c.bf16 %v2132_v42, %v2131_v43 }
  0xa0   : > { %v354_v45 = vpop.permute.xlu1 %353  ;;  %v351_v46 = vpop.permute.xlu0 %350 }
  0xa1   : > { %vm382_vm10 = vcmp.eq.s32.totalorder %v354_v45, %v2470_v23  ;;  %vm381_vm11 = vcmp.eq.s32.totalorder %v351_v46, %v2470_v23 }
  0xa2   : > { %v2134_v47 = vsel %vm382_vm10, 1.0, %v2376_v28  ;;  %v2133_v48 = vsel %vm381_vm11, 1.0, %v2376_v28  ;;  %2267 = vmatmul.mubr.msk.bf16.gmra.mrb[4].mxu0 %vm457_vm5, %v424_v44 }
  0xa3   : > { %v425_v49 = vpack.c.bf16 %v2134_v47, %v2133_v48 }
  0xa4   : > { %v360_v50 = vpop.permute.xlu1 %359  ;;  %v357_v51 = vpop.permute.xlu0 %356 }
  0xa5   : > { %vm384_vm12 = vcmp.eq.s32.totalorder %v360_v50, %v2470_v23  ;;  %vm383_vm13 = vcmp.eq.s32.totalorder %v357_v51, %v2470_v23  ;;  %2270 = vmatprep.mubr.msk.bf16.mxu0 %vm457_vm5, %v425_v49 }
  0xa6   : > { %v2136_v52 = vsel %vm384_vm12, 1.0, %v2376_v28  ;;  %v2135_v53 = vsel %vm383_vm13, 1.0, %v2376_v28  ;;  %vm3171_vm13 = vcmask 1041409  }
  0xa7   : > { %v426_v54 = vpack.c.bf16 %v2136_v52, %v2135_v53 }
  0xa8   : > { %v366_v55 = vpop.permute.xlu1 %365  ;;  %v363_v56 = vpop.permute.xlu0 %362 }
  0xa9   : > { %vm386_vm14 = vcmp.eq.s32.totalorder %v366_v55, %v2470_v23  ;;  %vm385_vm15 = vcmp.eq.s32.totalorder %v363_v56, %v2470_v23 }
  0xaa   : > { %v2138_v57 = vsel %vm386_vm14, 1.0, %v2376_v28  ;;  %v2137_v58 = vsel %vm385_vm15, 1.0, %v2376_v28  ;;  %2271 = vmatmul.mubr.msk.bf16.gmra.mrb[8].mxu0 %vm457_vm5, %v426_v54 }
  0xab   : > { %v427_v59 = vpack.c.bf16 %v2138_v57, %v2137_v58 }
  0xac   : > { %v372_v60 = vpop.permute.xlu1 %371  ;;  %v369_v61 = vpop.permute.xlu0 %368 }
  0xad   : > { %vm388_vm0 = vcmp.eq.s32.totalorder %v372_v60, %v2470_v23  ;;  %vm387_vm1 = vcmp.eq.s32.totalorder %v369_v61, %v2470_v23  ;;  %2274 = vmatprep.mubr.msk.bf16.mxu0 %vm457_vm5, %v427_v59 }
  0xae   : > { %v2140_v62 = vsel %vm388_vm0, 1.0, %v2376_v28  ;;  %v2139_v63 = vsel %vm387_vm1, 1.0, %v2376_v28  ;;  %vm3170_vm0 = vcmask 1042434  }
  0xaf   : > { %v428_v0 = vpack.c.bf16 %v2140_v62, %v2139_v63 }
  0xb2   : > { %2275 = vmatmul.mubr.msk.bf16.gmra.mrb[12].mxu0 %vm457_vm5, %v428_v0  ;;  %vm978_vm5 = vcmask 130048  }
 0x16d   : > { %v2505_v4 = vpop.f32.mrb[0].mxu0 }
 0x16e   : > { %v593_v5 = vrot.slane %v2505_v4, 1  ;;  %v2508_v6 = vpop.f32.mrb[1].mxu0  ;;  %v636_v7 = vrot.slane %v2505_v4, 2  ;;  %v677_v8 = vrot.slane %v2505_v4, 3 }
 0x16f   : > { %v591_v9 = vrot.slane %v2508_v6, 1  ;;  %v634_v10 = vrot.slane %v2508_v6, 2  ;;  %v2517_v11 = vpop.f32.mrb[2].mxu0  ;;  %v675_v22 = vrot.slane %v2508_v6, 3 }
 0x170   : > { %v584_v12 = vpack.c.bf16 %v2517_v11, %v2505_v4  ;;  %v594_v13 = vrot.slane %v2517_v11, 1  ;;  %v637_v14 = vrot.slane %v2517_v11, 2  ;;  %v678_v15 = vrot.slane %v2517_v11, 3  ;;  %v2524_v16 = vpop.f32.mrb[3].mxu0  ;;  %v2349_v11 = vld [vmem:[%s3164_s4 + $0x10] sm:$0xff]  }
 0x171   : > { %v583_v18 = vpack.c.bf16 %v2524_v16, %v2508_v6  ;;  %v592_v19 = vrot.slane %v2524_v16, 1  ;;  %v635_v20 = vrot.slane %v2524_v16, 2  ;;  %v676_v21 = vrot.slane %v2524_v16, 3 }
 0x172   : > { %v622_v23 = vsel %vm609_vm2, %v593_v5, %v594_v13  ;;  %v2539_v24 = vsel %vm650_vm3, %v636_v7, %v637_v14  ;;  %v2545_v25 = vsel %vm691_vm4, %v677_v8, %v678_v15 }
 0x173   : > { %v623_v26 = vsel %vm609_vm2, %v592_v19, %v593_v5  ;;  %v624_v27 = vsel %vm609_vm2, %v591_v9, %v592_v19  ;;  %v664_v28 = vsel %vm650_vm3, %v635_v20, %v636_v7  ;;  %v665_v29 = vsel %vm650_vm3, %v634_v10, %v635_v20 }
 0x174   : > { %v626_v30 = vpack.c.bf16 %v623_v26, %v624_v27  ;;  %v667_v31 = vpack.c.bf16 %v664_v28, %v665_v29  ;;  %v2561_v32 = vsel %vm691_vm4, %v676_v21, %v677_v8  ;;  %v2567_v33 = vsel %vm691_vm4, %v675_v22, %v676_v21 }
 0x175   : > { %v2574_v35 = vpop.f32.mrb[4].mxu0  ;;  %v708_v36 = vpack.c.bf16 %v2561_v32, %v2567_v33 }
 0x176   : > { %v597_v37 = vrot.slane %v2574_v35, 1  ;;  %v640_v38 = vrot.slane %v2574_v35, 2  ;;  %938 = vrot.lane.b32.xlu0 %v626_v30, %s2377_s30  ;;  %v2581_v39 = vpop.f32.mrb[5].mxu0  ;;  %v681_v40 = vrot.slane %v2574_v35, 3 }
 0x177   : > { %v595_v41 = vrot.slane %v2581_v39, 1  ;;  %v638_v42 = vrot.slane %v2581_v39, 2  ;;  %v679_v43 = vrot.slane %v2581_v39, 3  ;;  %v2588_v44 = vpop.f32.mrb[6].mxu0 }
 0x178   : > { %v586_v45 = vpack.c.bf16 %v2588_v44, %v2574_v35  ;;  %v598_v46 = vrot.slane %v2588_v44, 1  ;;  %v641_v47 = vrot.slane %v2588_v44, 2  ;;  %v682_v48 = vrot.slane %v2588_v44, 3  ;;  %v2595_v49 = vpop.f32.mrb[7].mxu0 }
 0x179   : > { %v585_v50 = vpack.c.bf16 %v2595_v49, %v2581_v39  ;;  %v596_v51 = vrot.slane %v2595_v49, 1  ;;  %v639_v52 = vrot.slane %v2595_v49, 2  ;;  %v680_v53 = vrot.slane %v2595_v49, 3 }
 0x17a   : > { %962 = vrot.lane.b32.xlu0 %v667_v31, %s2378_s9  ;;  %v621_v54 = vsel %vm609_vm2, %v594_v13, %v595_v41  ;;  %v662_v55 = vsel %vm650_vm3, %v637_v14, %v638_v42  ;;  %v618_v56 = vsel %vm609_vm2, %v597_v37, %v598_v46  ;;  %v2611_v57 = vsel %vm650_vm3, %v640_v38, %v641_v47 }
 0x17b   : > { %v627_v58 = vpack.c.bf16 %v621_v54, %v622_v23  ;;  %v619_v59 = vsel %vm609_vm2, %v596_v51, %v597_v37  ;;  %v620_v60 = vsel %vm609_vm2, %v595_v41, %v596_v51  ;;  %v668_v61 = vpack.c.bf16 %v662_v55, %v2539_v24 }
 0x17c   : > { %v628_v62 = vpack.c.bf16 %v619_v59, %v620_v60  ;;  %v660_v63 = vsel %vm650_vm3, %v639_v52, %v640_v38  ;;  %v661_v0 = vsel %vm650_vm3, %v638_v42, %v639_v52  ;;  %v2624_v1 = vsel %vm691_vm4, %v680_v53, %v681_v40 }
 0x17d   : > { %940 = vrot.lane.b32.xlu1 %v627_v58, %s2377_s30  ;;  %v2627_v2 = vpop.f32.mrb[8].mxu0  ;;  %v669_v5 = vpack.c.bf16 %v660_v63, %v661_v0  ;;  %v2631_v7 = vsel %vm691_vm4, %v679_v43, %v680_v53  ;;  %v2637_v8 = vsel %vm691_vm4, %v678_v15, %v679_v43  ;;  %v2643_v13 = vsel %vm691_vm4, %v681_v40, %v682_v48 }
 0x17e   : > { %v601_v14 = vrot.slane %v2627_v2, 1  ;;  %v644_v17 = vrot.slane %v2627_v2, 2  ;;  %v685_v19 = vrot.slane %v2627_v2, 3  ;;  %942 = vrot.lane.b32.xlu0 %v628_v62, %s2377_s30  ;;  %v2649_v20 = vpop.f32.mrb[9].mxu0  ;;  %v710_v15 = vpack.c.bf16 %v2624_v1, %v2631_v7 }
 0x17f   : > { %v599_v21 = vrot.slane %v2649_v20, 1  ;;  %v642_v23 = vrot.slane %v2649_v20, 2  ;;  %v683_v24 = vrot.slane %v2649_v20, 3  ;;  %v2656_v26 = vpop.f32.mrb[10].mxu0  ;;  %v709_v27 = vpack.c.bf16 %v2637_v8, %v2545_v25 }
 0x180   : > { %v602_v29 = vrot.slane %v2656_v26, 1  ;;  %v645_v30 = vrot.slane %v2656_v26, 2  ;;  %v686_v31 = vrot.slane %v2656_v26, 3  ;;  %v2665_v37 = vpop.f32.mrb[11].mxu0 }
 0x181   : > { %964 = vrot.lane.b32.xlu1 %v668_v61, %s2378_s9  ;;  %v600_v40 = vrot.slane %v2665_v37, 1  ;;  %v643_v41 = vrot.slane %v2665_v37, 2  ;;  %v684_v42 = vrot.slane %v2665_v37, 3  ;;  %v617_v43 = vsel %vm609_vm2, %v598_v46, %v599_v21 }
 0x182   : > { %966 = vrot.lane.b32.xlu0 %v669_v5, %s2378_s9  ;;  %v658_v51 = vsel %vm650_vm3, %v641_v47, %v642_v23  ;;  %v614_v52 = vsel %vm609_vm2, %v601_v14, %v602_v29  ;;  %v2682_v53 = vsel %vm650_vm3, %v644_v17, %v645_v30  ;;  %v629_v54 = vpack.c.bf16 %v617_v43, %v618_v56 }
 0x183   : > { %v615_v55 = vsel %vm609_vm2, %v600_v40, %v601_v14  ;;  %v616_v58 = vsel %vm609_vm2, %v599_v21, %v600_v40  ;;  %v670_v59 = vpack.c.bf16 %v658_v51, %v2611_v57  ;;  %v656_v47 = vsel %vm650_vm3, %v643_v41, %v644_v17 }
 0x184   : > { %v630_v46 = vpack.c.bf16 %v615_v55, %v616_v58  ;;  %v657_v60 = vsel %vm650_vm3, %v642_v23, %v643_v41  ;;  %v2695_v61 = vsel %vm691_vm4, %v684_v42, %v685_v19  ;;  %v698_v63 = vsel %vm691_vm4, %v683_v24, %v684_v42 }
 0x185   : > { %944 = vrot.lane.b32.xlu1 %v629_v54, %s2377_s30  ;;  %v2698_v56 = vpop.f32.mrb[12].mxu0  ;;  %v671_v62 = vpack.c.bf16 %v656_v47, %v657_v60  ;;  %v699_v57 = vsel %vm691_vm4, %v682_v48, %v683_v24  ;;  %v696_v0 = vsel %vm691_vm4, %v685_v19, %v686_v31  ;;  %v712_v23 = vpack.c.bf16 %v2695_v61, %v698_v63 }
 0x186   : > { %v605_v5 = vrot.slane %v2698_v56, 1  ;;  %v648_v14 = vrot.slane %v2698_v56, 2  ;;  %v689_v17 = vrot.slane %v2698_v56, 3  ;;  %946 = vrot.lane.b32.xlu0 %v630_v46, %s2377_s30  ;;  %v2714_v21 = vpop.f32.mrb[13].mxu0  ;;  %v711_v19 = vpack.c.bf16 %v699_v57, %v2643_v13 }
 0x187   : > { %v603_v40 = vrot.slane %v2714_v21, 1  ;;  %v646_v48 = vrot.slane %v2714_v21, 2  ;;  %v687_v24 = vrot.slane %v2714_v21, 3  ;;  %v2720_v41 = vpop.f32.mrb[14].mxu0 }
 0x188   : > { %v606_v43 = vrot.slane %v2720_v41, 1  ;;  %v649_v51 = vrot.slane %v2720_v41, 2  ;;  %v690_v54 = vrot.slane %v2720_v41, 3  ;;  %v2728_v55 = vpop.f32.mrb[15].mxu0 }
 0x189   : > { %968 = vrot.lane.b32.xlu1 %v670_v59, %s2378_s9  ;;  %v604_v46 = vrot.slane %v2728_v55, 1  ;;  %v647_v13 = vrot.slane %v2728_v55, 2  ;;  %v688_v47 = vrot.slane %v2728_v55, 3  ;;  %v613_v60 = vsel %vm609_vm2, %v602_v29, %v603_v40 }
 0x18a   : > { %970 = vrot.lane.b32.xlu0 %v671_v62, %s2378_s9  ;;  %v654_v61 = vsel %vm650_vm3, %v645_v30, %v646_v48  ;;  %v610_v59 = vsel %vm609_vm2, %v605_v5, %v606_v43  ;;  %v625_v63 = vsel %vm609_vm2, %v606_v43, %v591_v9  ;;  %v631_v57 = vpack.c.bf16 %v613_v60, %v614_v52 }
 0x18b   : > { %v611_v42 = vsel %vm609_vm2, %v604_v46, %v605_v5  ;;  %v612_v62 = vsel %vm609_vm2, %v603_v40, %v604_v46  ;;  %v672_v29 = vpack.c.bf16 %v654_v61, %v2682_v53  ;;  %v652_v30 = vsel %vm650_vm3, %v647_v13, %v648_v14 }
 0x18c   : > { %v632_v58 = vpack.c.bf16 %v611_v42, %v612_v62  ;;  %v653_v28 = vsel %vm650_vm3, %v646_v48, %v647_v13  ;;  %v633_v38 = vpack.c.bf16 %v625_v63, %v610_v59  ;;  %v651_v52 = vsel %vm650_vm3, %v648_v14, %v649_v51 }
 0x18d   : > { %948 = vrot.lane.b32.xlu1 %v631_v57, %s2377_s30  ;;  %v673_v9 = vpack.c.bf16 %v652_v30, %v653_v28  ;;  %v666_v5 = vsel %vm650_vm3, %v649_v51, %v634_v10  ;;  %v693_v53 = vsel %vm691_vm4, %v688_v47, %v689_v17  ;;  %v694_v48 = vsel %vm691_vm4, %v687_v24, %v688_v47 }
 0x18e   : > { %950 = vrot.lane.b32.xlu0 %v632_v58, %s2377_s30  ;;  %v674_v40 = vpack.c.bf16 %v666_v5, %v651_v52  ;;  %v695_v28 = vsel %vm691_vm4, %v686_v31, %v687_v24  ;;  %v692_v14 = vsel %vm691_vm4, %v689_v17, %v690_v54  ;;  %v714_v42 = vpack.c.bf16 %v693_v53, %v694_v48  ;;  %v2352_v48 = vld [vmem:[%s3166_s6] sm:$0xff]  }
 0x18f   : > { %v713_v43 = vpack.c.bf16 %v695_v28, %v696_v0  ;;  %v707_v10 = vsel %vm691_vm4, %v690_v54, %v675_v22  ;;  %v3174_v17 = vpack.c.bf16 %v2656_v26, %v2627_v2  ;;  %v3176_v2 = vpack.c.bf16 %v2720_v41, %v2698_v56  ;;  %v2353_v28 = vld [vmem:[%s3166_s6 + $0x48] sm:$0xff]  }
 0x190   : > { %v715_v51 = vpack.c.bf16 %v707_v10, %v692_v14  ;;  %v2354_v14 = vld [vmem:[%s3166_s6 + $0x8] sm:$0xff]   ;;  %v2357_v10 = vld [vmem:[%s3166_s6 + $0x58] sm:$0xff]   ;;  %vm3169_vm3 = vcmask 1043459  }
 0x191   : > { %972 = vrot.lane.b32.xlu1 %v672_v29, %s2378_s9 }
 0x192   : > { %974 = vrot.lane.b32.xlu0 %v673_v9, %s2378_s9 }
 0x195   : > { %952 = vrot.lane.b32.xlu1 %v633_v38, %s2377_s30 }
 0x196   : > { %1311 = vrot.lane.b32.xlu0 %v708_v36, %s2379_s10 }
 0x199   : > { %976 = vrot.lane.b32.xlu1 %v674_v40, %s2378_s9  ;;  %v2351_v40 = vld [vmem:[%s3166_s6 + $0x40] sm:$0xff]  }
 0x19a   : > { %1315 = vrot.lane.b32.xlu0 %v710_v15, %s2379_s10  ;;  %v2348_v15 = vld [vmem:[%s3164_s4 + $0x8] sm:$0xff]   ;;  %2232 = vmatprep.subr.bf16.mxu0 %v2351_v40 }
 0x19b   : > { %2233 = vmatpush3.bf16.msra.mxu0 %v2352_v48 }
 0x19c   : > { %2234 = vmatprep.subr.bf16.mxu0 %v2353_v28 }
 0x19d   : > { %1313 = vrot.lane.b32.xlu1 %v709_v27, %s2379_s10 }
 0x19e   : > { %1319 = vrot.lane.b32.xlu0 %v712_v23, %s2379_s10  ;;  %v3175_v23 = vpack.c.bf16 %v2728_v55, %v2714_v21 }
 0x19f   : > { %2235 = vmatpush3.bf16.msra.mxu0 %v2354_v14  ;;  %v721_v14 = vadd.s32 48, %v2503_v3 }
 0x1a1   : > { %1317 = vrot.lane.b32.xlu1 %v711_v19, %s2379_s10 }
 0x1a2   : > { %1323 = vrot.lane.b32.xlu0 %v714_v42, %s2379_s10  ;;  %v2355_v42 = vld [vmem:[%s3166_s6 + $0x50] sm:$0xff]  }
 0x1a3   : > { %2236 = vmatprep.subr.bf16.mxu0 %v2355_v42 }
 0x1a5   : > { %1321 = vrot.lane.b32.xlu1 %v713_v43, %s2379_s10  ;;  %v2356_v43 = vld [vmem:[%s3166_s6 + $0x10] sm:$0xff]  }
 0x1a6   : > { %2237 = vmatpush3.bf16.msra.mxu0 %v2356_v43 }
 0x1a7   : > { %2238 = vmatprep.subr.bf16.mxu0 %v2357_v10 }
 0x1a9   : > { %1325 = vrot.lane.b32.xlu1 %v715_v51, %s2379_s10  ;;  %v2358_v51 = vld [vmem:[%s3166_s6 + $0x18] sm:$0xff]  }
 0x1aa   : > { %2239 = vmatpush3.bf16.msra.mxu0 %v2358_v51  ;;  %v719_v51 = vadd.s32 32, %v2503_v3 }
 0x1e8   : > { %v939_v22 = vpop.permute.xlu0 %938 }
 0x1e9   : > { %v981_v32 = vsel %vm978_vm5, %v583_v18, %v939_v22  ;;  %v2359_v22 = vld [vmem:[%s3166_s6 + $0x60] sm:$0xff]  }
 0x1ea   : > { %2240 = vmatprep.subr.bf16.mxu0 %v2359_v22 }
 0x1ec   : > { %v963_v33 = vpop.permute.xlu0 %962 }
 0x1ed   : > { %v1005_v36 = vsel %vm1003_vm6, %v981_v32, %v963_v33  ;;  %v2360_v32 = vld [vmem:[%s3166_s6 + $0x20] sm:$0xff]   ;;  %v2361_v33 = vld [vmem:[%s3166_s6 + $0x68] sm:$0xff]  }
 0x1ee   : > { %2284 = vmatprep.mubr.msk.bf16.mxu1 %vm1044_vm7, %v1005_v36  ;;  %2241 = vmatpush3.bf16.msra.mxu0 %v2360_v32 }
 0x1ef   : > { %v941_v25 = vpop.permute.xlu1 %940  ;;  %2242 = vmatprep.subr.bf16.mxu0 %v2361_v33 }
 0x1f0   : > { %v943_v1 = vpop.permute.xlu0 %942  ;;  %v984_v7 = vsel %vm978_vm5, %v584_v12, %v941_v25  ;;  %v2363_v25 = vld [vmem:[%s3166_s6 + $0x70] sm:$0xff]  }
 0x1f1   : > { %v987_v6 = vsel %vm978_vm5, %v585_v50, %v943_v1  ;;  %v3173_v50 = vpack.c.bf16 %v2665_v37, %v2649_v20  ;;  %v2364_v1 = vld [vmem:[%s3166_s6 + $0x30] sm:$0xff]  }
 0x1f3   : > { %v965_v8 = vpop.permute.xlu1 %964 }
 0x1f4   : > { %v1007_v16 = vsel %vm1003_vm6, %v984_v7, %v965_v8  ;;  %v967_v18 = vpop.permute.xlu0 %966  ;;  %v2365_v7 = vld [vmem:[%s3166_s6 + $0x78] sm:$0xff]  }
 0x1f5   : > { %2285 = vmatmul.mubr.msk.bf16.vlgmr.msra.gmra.mrb[0].mxu1 %vm1044_vm7, %v1007_v16  ;;  %v1009_v27 = vsel %vm1003_vm6, %v987_v6, %v967_v18  ;;  %v2366_v8 = vld [vmem:[%s3166_s6 + $0x38] sm:$0xff]   ;;  %v716_v6 = vadd.s32 8, %v2503_v3 }
 0x1f6   : > { %2301 = vmatpush3.bf16.msra.mxu1 %v2572_v34  ;;  %2288 = vmatprep.mubr.msk.bf16.mxu1 %vm1044_vm7, %v1009_v27  ;;  %v2350_v34 = vld [vmem:[%s3164_s4 + $0x18] sm:$0xff]  }
 0x1f7   : > { %v945_v4 = vpop.permute.xlu1 %944  ;;  %2302 = vmatprep.subr.bf16.mxu1 %v2348_v15 }
 0x1f8   : > { %v947_v12 = vpop.permute.xlu0 %946  ;;  %v990_v39 = vsel %vm978_vm5, %v586_v45, %v945_v4 }
 0x1f9   : > { %v993_v31 = vsel %vm978_vm5, %v3173_v50, %v947_v12 }
 0x1fa   : > { %2303 = vmatpush3.bf16.msra.mxu1 %v2348_v15  ;;  %v718_v15 = vadd.s32 24, %v2503_v3 }
 0x1fb   : > { %v969_v49 = vpop.permute.xlu1 %968  ;;  %2304 = vmatprep.subr.bf16.mxu1 %v2349_v11 }
 0x1fc   : > { %v1011_v38 = vsel %vm1003_vm6, %v990_v39, %v969_v49  ;;  %v971_v0 = vpop.permute.xlu0 %970  ;;  %v722_v49 = vadd.s32 56, %v2503_v3 }
 0x1fd   : > { %2289 = vmatmul.mubr.msk.bf16.gmra.mrb[4].mxu1 %vm1044_vm7, %v1011_v38  ;;  %v1013_v35 = vsel %vm1003_vm6, %v993_v31, %v971_v0  ;;  %v726_v0 = vadd.s32 88, %v2503_v3 }
 0x1fe   : > { %2292 = vmatprep.mubr.msk.bf16.mxu1 %vm1044_vm7, %v1013_v35  ;;  %2305 = vmatpush3.bf16.msra.mxu1 %v2349_v11  ;;  %v2922_v11 = vand.u32 15, %v716_v6 }
 0x1ff   : > { %v949_v44 = vpop.permute.xlu1 %948  ;;  %2306 = vmatprep.subr.bf16.mxu1 %v2350_v34 }
 0x200   : > { %v951_v45 = vpop.permute.xlu0 %950  ;;  %v996_v20 = vsel %vm978_vm5, %v3174_v17, %v949_v44  ;;  %vm1175_vm10 = vcmp.le.s32.totalorder %v2922_v11, 13  ;;  %v717_v17 = vadd.s32 16, %v2503_v3 }
 0x201   : > { %v999_v24 = vsel %vm978_vm5, %v3175_v23, %v951_v45  ;;  %v724_v45 = vadd.s32 72, %v2503_v3  ;;  %v2935_v23 = vand.u32 15, %v722_v49 }
 0x202   : > { %2307 = vmatpush3.bf16.msra.mxu1 %v2350_v34  ;;  %v720_v34 = vadd.s32 40, %v2503_v3 }
 0x203   : > { %v973_v37 = vpop.permute.xlu1 %972  ;;  %vm1181_vm11 = vcmp.le.s32.totalorder %v2935_v23, 13 }
 0x204   : > { %v1015_v19 = vsel %vm1003_vm6, %v996_v20, %v973_v37  ;;  %v975_v54 = vpop.permute.xlu0 %974 }
 0x205   : > { %2293 = vmatmul.mubr.msk.bf16.gmra.mrb[8].mxu1 %vm1044_vm7, %v1015_v19  ;;  %v1017_v58 = vsel %vm1003_vm6, %v999_v24, %v975_v54  ;;  %v2937_v24 = vand.u32 15, %v720_v34 }
 0x206   : > { %2296 = vmatprep.mubr.msk.bf16.mxu1 %vm1044_vm7, %v1017_v58 }
 0x207   : > { %v953_v46 = vpop.permute.xlu1 %952  ;;  %vm1179_vm12 = vcmp.le.s32.totalorder %v2937_v24, 13 }
 0x208   : > { %v1312_v13 = vpop.permute.xlu0 %1311  ;;  %v1002_v26 = vsel %vm978_vm5, %v3176_v2, %v953_v46 }
 0x209   : > { %v1328_v55 = vsel %vm1044_vm7, %v1005_v36, %v1312_v13  ;;  %v2362_v36 = vld [vmem:[%s3166_s6 + $0x28] sm:$0xff]  }
 0x20a   : > { %2243 = vmatpush3.bf16.msra.mxu0 %v2362_v36 }
 0x20b   : > { %v977_v47 = vpop.permute.xlu1 %976  ;;  %2244 = vmatprep.subr.bf16.mxu0 %v2363_v25 }
 0x20c   : > { %v1019_v21 = vsel %vm1003_vm6, %v1002_v26, %v977_v47  ;;  %v1316_v61 = vpop.permute.xlu0 %1315  ;;  %v730_v26 = vadd.s32 120, %v2503_v3  ;;  %v728_v47 = vadd.s32 104, %v2503_v3  ;;  %vm1504_vm6 = vcmp.le.s32.totalorder %v2922_v11, 12 }
 0x20d   : > { %2297 = vmatmul.mubr.msk.bf16.gmra.mrb[12].mxu1 %vm1044_vm7, %v1019_v21  ;;  %v1332_v63 = vsel %vm1044_vm7, %v1009_v27, %v1316_v61  ;;  %v2920_v27 = vand.u32 15, %v718_v15  ;;  %v749_v61 = vand.u32 15, %v717_v17 }
 0x20e   : > { %2308 = vmatprep.mubr.msk.bf16.mxu1 %vm1373_vm8, %v1328_v55  ;;  %2245 = vmatpush3.bf16.msra.mxu0 %v2364_v1 }
 0x20f   : > { %v1314_v60 = vpop.permute.xlu1 %1313  ;;  %2246 = vmatprep.subr.bf16.mxu0 %v2365_v7  ;;  %vm1177_vm9 = vcmp.le.s32.totalorder %v2920_v27, 13  ;;  %v2958_v28 = vand.u32 1, %v749_v61  ;;  %v1544_v15 = vand.u32 1, %v2920_v27  ;;  %vm1506_vm4 = vcmp.le.s32.totalorder %v2920_v27, 12 }
 0x210   : > { %v1330_v59 = vsel %vm1044_vm7, %v1007_v16, %v1314_v60  ;;  %v1320_v41 = vpop.permute.xlu0 %1319  ;;  %v2918_v16 = vld [vmem:[%s3163_s3] ss:$0 sm:$0xff]  ;;  %v2943_v60 = vand.u32 15, %v724_v45  ;;  %v727_v27 = vadd.s32 96, %v2503_v3 }
 0x211   : > { %v1336_v62 = vsel %vm1044_vm7, %v1013_v35, %v1320_v41  ;;  %vm2986_vm5 = vcmp.eq.s32.totalorder %v1544_v15, 0 }
 0x212   : > { %2247 = vmatpush3.bf16.msra.mxu0 %v2366_v8  ;;  %vm1183_vm15 = vcmp.le.s32.totalorder %v2943_v60, 13 }
 0x213   : > { %v1318_v56 = vpop.permute.xlu1 %1317 }
 0x214   : > { %v1334_v57 = vsel %vm1044_vm7, %v1011_v38, %v1318_v56  ;;  %v1324_v30 = vpop.permute.xlu0 %1323 }
 0x215   : > { %2309 = vmatmul.mubr.msk.bf16.vlgmr.msra.gmra.mrb[16].mxu1 %vm1373_vm8, %v1330_v59  ;;  %v1340_v52 = vsel %vm1044_vm7, %v1017_v58, %v1324_v30  ;;  %v2939_v58 = vand.u32 15, %v726_v0  ;;  %v735_v30 = vand.u32 15, %v2503_v3 }
 0x216   : > { %2312 = vmatprep.mubr.msk.bf16.mxu1 %vm1373_vm8, %v1332_v63 }
 0x217   : > { %v1322_v29 = vpop.permute.xlu1 %1321  ;;  %vm1185_vm14 = vcmp.le.s32.totalorder %v2939_v58, 13  ;;  %v2964_v36 = vand.u32 1, %v735_v30 }
 0x218   : > { %v1338_v9 = vsel %vm1044_vm7, %v1015_v19, %v1322_v29 }
 0x21b   : > { %v1326_v5 = vpop.permute.xlu1 %1325 }
 0x21c   : > { %v1342_v53 = vsel %vm1044_vm7, %v1019_v21, %v1326_v5  ;;  %v2953_v5 = vand.u32 15, %v730_v26  ;;  %v723_v26 = vadd.s32 64, %v2503_v3 }
 0x21d   : > { %2313 = vmatmul.mubr.msk.bf16.gmra.mrb[20].mxu1 %vm1373_vm8, %v1334_v57 }
 0x21e   : > { %2316 = vmatprep.mubr.msk.bf16.mxu1 %vm1373_vm8, %v1336_v62  ;;  %vm1189_vm1 = vcmp.le.s32.totalorder %v2953_v5, 13 }
 0x225   : > { %2317 = vmatmul.mubr.msk.bf16.gmra.mrb[24].mxu1 %vm1373_vm8, %v1338_v9 }
 0x226   : > { %2320 = vmatprep.mubr.msk.bf16.mxu1 %vm1373_vm8, %v1340_v52 }
 0x22d   : > { %2321 = vmatmul.mubr.msk.bf16.gmra.mrb[28].mxu1 %vm1373_vm8, %v1342_v53  ;;  %v2955_v53 = vand.u32 15, %v728_v47  ;;  %vm1713_vm8 = vcmp.eq.s32.totalorder %v2958_v28, 0 }
 0x22f   : > { %vm1187_vm2 = vcmp.le.s32.totalorder %v2955_v53, 13 }
 0x2c8   : > { %v2286_v18 = vpop.f32.mrb[0].mxu1 }
 0x2c9   : > { %v1095_v4 = vpop.f32.mrb[1].mxu1  ;;  %v1104_v12 = vadd.f32 %v2286_v18, %v2918_v16 }
 0x2ca   : > { %v2287_v39 = vpop.f32.mrb[2].mxu1  ;;  %v1096_v50 = vadd.f32 %v2918_v16, %v1095_v4 }
 0x2cb   : > { %v1107_v31 = vadd.f32 %v2287_v39, %v2918_v16  ;;  %v1098_v38 = vpop.f32.mrb[3].mxu1  ;;  %v1160_v20 = vmax.f32 %v1104_v12, 0.0  ;;  %v1530_v12 = vand.u32 1, %v2922_v11  ;;  %v777_v39 = vand.u32 15, %v721_v14 }
 0x2cc   : > { %v1099_v35 = vadd.f32 %v2918_v16, %v1098_v38  ;;  %v1158_v19 = vmax.f32 %v1096_v50, 0.0  ;;  %v763_v38 = vand.u32 15, %v719_v51 }
 0x2cd   : > { %v1161_v44 = vmax.f32 %v1107_v31, 0.0  ;;  %v2978_v61 = vand.u32 1, %v777_v39  ;;  %vm2994_vm7 = vcmp.eq.s32.totalorder %v1530_v12, 0  ;;  %v1558_v12 = vand.u32 1, %v2937_v24 }
 0x2ce   : > { %v1159_v37 = vmax.f32 %v1099_v35, 0.0 }
 0x2cf   : > { %v1225_v54 = vsel %vm1177_vm9, %v1161_v44, 0.0  ;;  %vm1711_vm9 = vcmp.eq.s32.totalorder %v2964_v36, 0 }
 0x2d0   : > { %v1245_v46 = vmax.f32 %v1160_v20, %v1225_v54  ;;  %v1223_v13 = vsel %vm1175_vm10, %v1159_v37, 0.0  ;;  %v2290_v2 = vpop.f32.mrb[4].mxu1  ;;  %v725_v54 = vadd.s32 80, %v2503_v3  ;;  %vm1861_vm10 = vcmask 1044484  }
 0x2d1   : > { %v1238_v21 = vmax.f32 %v1158_v19, %v1223_v13  ;;  %v1111_v55 = vpop.f32.mrb[5].mxu1  ;;  %v1120_v63 = vadd.f32 %v2290_v2, %v2918_v16 }
 0x2d2   : > { %v1246_v59 = vrot.slane %v1245_v46, 4  ;;  %v2291_v56 = vpop.f32.mrb[6].mxu1  ;;  %v1112_v57 = vadd.f32 %v2918_v16, %v1111_v55 }
 0x2d3   : > { %v1239_v41 = vrot.slane %v1238_v21, 4  ;;  %v1123_v62 = vadd.f32 %v2291_v56, %v2918_v16  ;;  %v1114_v29 = vpop.f32.mrb[7].mxu1  ;;  %v1164_v43 = vmax.f32 %v1120_v63, 0.0 }
 0x2d4   : > { %v1247_v9 = vmax.f32 %v1245_v46, %v1246_v59  ;;  %v1115_v52 = vadd.f32 %v2918_v16, %v1114_v29  ;;  %v1162_v32 = vmax.f32 %v1112_v57, 0.0 }
 0x2d5   : > { %v1240_v40 = vmax.f32 %v1238_v21, %v1239_v41  ;;  %v1165_v48 = vmax.f32 %v1123_v62, 0.0 }
 0x2d6   : > { %v1248_v42 = vrot.slane %v1247_v9, 2  ;;  %v1163_v10 = vmax.f32 %v1115_v52, 0.0 }
 0x2d7   : > { %v1241_v22 = vrot.slane %v1240_v40, 2  ;;  %v1229_v33 = vsel %vm1181_vm11, %v1165_v48, 0.0  ;;  %vm3172_vm11 = vcmask 1045509  }
 0x2d8   : > { %v1249_v25 = vmax.f32 %v1247_v9, %v1248_v42  ;;  %v1259_v1 = vmax.f32 %v1164_v43, %v1229_v33  ;;  %v1227_v7 = vsel %vm1179_vm12, %v1163_v10, 0.0  ;;  %v2294_v8 = vpop.f32.mrb[8].mxu1  ;;  %v805_v9 = vand.u32 15, %v725_v54 }
 0x2d9   : > { %v1242_v6 = vmax.f32 %v1240_v40, %v1241_v22  ;;  %v1252_v18 = vmax.f32 %v1162_v32, %v1227_v7  ;;  %v1127_v4 = vpop.f32.mrb[9].mxu1  ;;  %v1136_v50 = vadd.f32 %v2294_v8, %v2918_v16  ;;  %v2990_v42 = vand.u32 1, %v763_v38 }
 0x2da   : > { %v1250_v49 = vrot.slane %v1249_v25, 1  ;;  %v1260_v34 = vrot.slane %v1259_v1, 4  ;;  %v2295_v31 = vpop.f32.mrb[10].mxu1  ;;  %v1128_v44 = vadd.f32 %v2918_v16, %v1127_v4  ;;  %v791_v43 = vand.u32 15, %v723_v26 }
 0x2db   : > { %v1243_v0 = vrot.slane %v1242_v6, 1  ;;  %v1253_v35 = vrot.slane %v1252_v18, 4  ;;  %v1139_v45 = vadd.f32 %v2295_v31, %v2918_v16  ;;  %v1130_v17 = vpop.f32.mrb[11].mxu1  ;;  %v1168_v21 = vmax.f32 %v1136_v50, 0.0 }
 0x2dc   : > { %v1251_v20 = vmax.f32 %v1249_v25, %v1250_v49  ;;  %v1261_v37 = vmax.f32 %v1259_v1, %v1260_v34  ;;  %v1131_v19 = vadd.f32 %v2918_v16, %v1130_v17  ;;  %v1166_v56 = vmax.f32 %v1128_v44, 0.0 }
 0x2dd   : > { %v1244_v46 = vmax.f32 %v1242_v6, %v1243_v0  ;;  %v1254_v13 = vmax.f32 %v1252_v18, %v1253_v35  ;;  %v1169_v2 = vmax.f32 %v1139_v45, 0.0  ;;  %v1572_v25 = vand.u32 1, %v2935_v23 }
 0x2de   : > { %v1262_v47 = vrot.slane %v1261_v37, 2  ;;  %v1167_v55 = vmax.f32 %v1131_v19, 0.0  ;;  %v3005_v39 = vand.u32 1, %v805_v9  ;;  %v3007_v31 = vand.u32 1, %v791_v43 }
 0x2df   : > { %v1856_v59 = vsel %vm3171_vm13, %v1251_v20, %v1244_v46  ;;  %v1255_v63 = vrot.slane %v1254_v13, 2  ;;  %v1233_v41 = vsel %vm1185_vm14, %v1169_v2, 0.0  ;;  %vm1510_vm12 = vcmp.le.s32.totalorder %v2935_v23, 12 }
 0x2e0   : > { %v1263_v57 = vmax.f32 %v1261_v37, %v1262_v47  ;;  %v1273_v62 = vmax.f32 %v1168_v21, %v1233_v41  ;;  %v1231_v29 = vsel %vm1183_vm15, %v1167_v55, 0.0  ;;  %v2298_v30 = vpop.f32.mrb[12].mxu1  ;;  %vm3022_vm14 = vcmp.eq.s32.totalorder %v1572_v25, 0 }
 0x2e1   : > { %v1256_v52 = vmax.f32 %v1254_v13, %v1255_v63  ;;  %v1266_v40 = vmax.f32 %v1166_v56, %v1231_v29  ;;  %v1143_v48 = vpop.f32.mrb[13].mxu1  ;;  %v1152_v22 = vadd.f32 %v2298_v30, %v2918_v16  ;;  %v1600_v63 = vand.u32 1, %v2939_v58 }
 0x2e2   : > { %v1264_v10 = vrot.slane %v1263_v57, 1  ;;  %v1274_v51 = vrot.slane %v1273_v62, 4  ;;  %v2299_v32 = vpop.f32.mrb[14].mxu1  ;;  %v1144_v8 = vadd.f32 %v2918_v16, %v1143_v48  ;;  %vm1508_vm15 = vcmp.le.s32.totalorder %v2937_v24, 12 }
 0x2e3   : > { %v1257_v1 = vrot.slane %v1256_v52, 1  ;;  %v1267_v7 = vrot.slane %v1266_v40, 4  ;;  %v1155_v15 = vadd.f32 %v2299_v32, %v2918_v16  ;;  %v1146_v6 = vpop.f32.mrb[15].mxu1  ;;  %v1172_v35 = vmax.f32 %v1152_v22, 0.0 }
 0x2e4   : > { %v1275_v18 = vmax.f32 %v1273_v62, %v1274_v51  ;;  %v1147_v4 = vadd.f32 %v2918_v16, %v1146_v6  ;;  %v1265_v38 = vmax.f32 %v1263_v57, %v1264_v10  ;;  %v3012_v16 = vld [vmem:[%s3165_s5] ss:$0 sm:$0xff]  ;;  %v1170_v20 = vmax.f32 %v1144_v8, 0.0 }
 0x2e5   : > { %v1258_v49 = vmax.f32 %v1256_v52, %v1257_v1  ;;  %v1268_v34 = vmax.f32 %v1266_v40, %v1267_v7  ;;  %v1173_v50 = vmax.f32 %v1155_v15, 0.0  ;;  %v1586_v30 = vand.u32 1, %v2943_v60 }
 0x2e6   : > { %v1276_v0 = vrot.slane %v1275_v18, 2  ;;  %v1171_v44 = vmax.f32 %v1147_v4, 0.0  ;;  %v729_v25 = vadd.s32 112, %v2503_v3  ;;  %vm1865_vm13 = vcmask 1046534  }
 0x2e7   : > { %v1858_v45 = vsel %vm3170_vm0, %v1258_v49, %v1856_v59  ;;  %v1269_v17 = vrot.slane %v1268_v34, 2  ;;  %v1237_v37 = vsel %vm1189_vm1, %v1173_v50, 0.0  ;;  %vm3029_vm1 = vcmp.eq.s32.totalorder %v1558_v12, 0 }
 0x2e8   : > { %v1277_v19 = vmax.f32 %v1275_v18, %v1276_v0  ;;  %v1287_v54 = vmax.f32 %v1172_v35, %v1237_v37  ;;  %v1235_v46 = vsel %vm1187_vm2, %v1171_v44, 0.0  ;;  %v2310_v13 = vpop.f32.mrb[16].mxu1  ;;  %v1860_v2 = vsel %vm3169_vm3, %v1265_v38, %v1858_v45  ;;  %vm3040_vm3 = vmand %vm1506_vm4, %vm2986_vm5 }
 0x2e9   : > { %v1270_v26 = vmax.f32 %v1268_v34, %v1269_v17  ;;  %v1280_v47 = vmax.f32 %v1170_v20, %v1235_v46  ;;  %v1433_v21 = vadd.f32 %v2310_v13, %v3012_v16  ;;  %v1424_v55 = vpop.f32.mrb[17].mxu1  ;;  %vm1715_vm0 = vcmp.eq.s32.totalorder %v2990_v42, 0  ;;  %vm1728_vm2 = vmand %vm1504_vm6, %vm2994_vm7 }
 0x2ea   : > { %v1278_v56 = vrot.slane %v1277_v19, 1  ;;  %v1288_v41 = vrot.slane %v1287_v54, 4  ;;  %v1425_v57 = vadd.f32 %v3012_v16, %v1424_v55  ;;  %v2311_v62 = vpop.f32.mrb[18].mxu1  ;;  %vm1867_vm4 = vcmask 1047559  }
 0x2eb   : > { %v1271_v9 = vrot.slane %v1270_v26, 1  ;;  %v1281_v52 = vrot.slane %v1280_v47, 4  ;;  %v1489_v40 = vmax.f32 %v1433_v21, 0.0  ;;  %v1436_v48 = vadd.f32 %v2311_v62, %v3012_v16  ;;  %v1427_v43 = vpop.f32.mrb[19].mxu1 }
 0x2ec   : > { %v1289_v10 = vmax.f32 %v1287_v54, %v1288_v41  ;;  %v1487_v51 = vmax.f32 %v1425_v57, 0.0  ;;  %v1428_v32 = vadd.f32 %v3012_v16, %v1427_v43  ;;  %v1279_v14 = vmax.f32 %v1277_v19, %v1278_v56 }
 0x2ed   : > { %v1272_v1 = vmax.f32 %v1270_v26, %v1271_v9  ;;  %v1282_v7 = vmax.f32 %v1280_v47, %v1281_v52  ;;  %v1490_v8 = vmax.f32 %v1436_v48, 0.0  ;;  %v1777_v6 = vsel %vm1713_vm8, %v1489_v40, 0.0  ;;  %vm3077_vm8 = vmand %vm1510_vm12, %vm3022_vm14 }
 0x2ee   : > { %v1290_v15 = vrot.slane %v1289_v10, 2  ;;  %v1488_v18 = vmax.f32 %v1428_v32, 0.0  ;;  %v1775_v12 = vsel %vm1711_vm9, %v1487_v51, 0.0  ;;  %vm1514_vm5 = vcmp.le.s32.totalorder %v2939_v58, 12 }
 0x2ef   : > { %v1283_v4 = vrot.slane %v1282_v7, 2  ;;  %v1778_v49 = vsel %vm3040_vm3, %v1490_v8, 0.0  ;;  %v1862_v33 = vsel %vm1861_vm10, %v1272_v1, %v1860_v2  ;;  %vm3062_vm6 = vcmp.eq.s32.totalorder %v1600_v63, 0 }
 0x2f0   : > { %v1291_v11 = vmax.f32 %v1289_v10, %v1290_v15  ;;  %v1798_v34 = vmax.f32 %v1777_v6, %v1778_v49  ;;  %v1776_v50 = vsel %vm1728_vm2, %v1488_v18, 0.0  ;;  %v2314_v3 = vpop.f32.mrb[20].mxu1  ;;  %v1864_v38 = vsel %vm3172_vm11, %v1279_v14, %v1862_v33  ;;  %vm1732_vm2 = vmand %vm1508_vm15, %vm3029_vm1 }
 0x2f1   : > { %v1284_v0 = vmax.f32 %v1282_v7, %v1283_v4  ;;  %v1791_v35 = vmax.f32 %v1775_v12, %v1776_v50  ;;  %v1449_v28 = vadd.f32 %v2314_v3, %v3012_v16  ;;  %v1440_v44 = vpop.f32.mrb[21].mxu1  ;;  %v833_v45 = vand.u32 15, %v729_v25  ;;  %vm1738_vm14 = vmand %vm1514_vm5, %vm3062_vm6 }
 0x2f2   : > { %v1292_v17 = vrot.slane %v1291_v11, 1  ;;  %v1799_v20 = vrot.slane %v1798_v34, 4  ;;  %v1441_v37 = vadd.f32 %v3012_v16, %v1440_v44  ;;  %v2315_v19 = vpop.f32.mrb[22].mxu1  ;;  %vm1512_vm3 = vcmp.le.s32.totalorder %v2943_v60, 12 }
 0x2f3   : > { %vm3068_vm7 = vcmp.eq.s32.totalorder %v1586_v30, 0  ;;  %v1285_v46 = vrot.slane %v1284_v0, 1  ;;  %v1792_v13 = vrot.slane %v1791_v35, 4  ;;  %v1493_v2 = vmax.f32 %v1449_v28, 0.0  ;;  %v1443_v47 = vpop.f32.mrb[23].mxu1 }
 0x2f4   : > { %v1452_v26 = vadd.f32 %v2315_v19, %v3012_v16  ;;  %v1800_v21 = vmax.f32 %v1798_v34, %v1799_v20  ;;  %v1491_v55 = vmax.f32 %v1441_v37, 0.0  ;;  %v1444_v56 = vadd.f32 %v3012_v16, %v1443_v47  ;;  %vm1736_vm15 = vmand %vm1512_vm3, %vm3068_vm7 }
 0x2f5   : > { %vm1721_vm9 = vcmp.eq.s32.totalorder %v3005_v39, 0  ;;  %v819_v41 = vand.u32 15, %v727_v27  ;;  %v1286_v57 = vmax.f32 %v1284_v0, %v1285_v46  ;;  %v1793_v62 = vmax.f32 %v1791_v35, %v1792_v13 }
 0x2f6   : > { %v1494_v30 = vmax.f32 %v1452_v26, 0.0  ;;  %vm1719_vm11 = vcmp.eq.s32.totalorder %v3007_v31, 0  ;;  %v3088_v23 = vand.u32 1, %v833_v45  ;;  %v1293_v59 = vmax.f32 %v1291_v11, %v1292_v17 }
 0x2f7   : > { %v1801_v9 = vrot.slane %v1800_v21, 2  ;;  %vm3193_vm12 = vcmp.eq.s32.totalorder %v2978_v61, 0  ;;  %v1492_v40 = vmax.f32 %v1444_v56, 0.0  ;;  %v1794_v48 = vrot.slane %v1793_v62, 2 }
 0x2f8   : > { %v1781_v52 = vsel %vm3193_vm12, %v1493_v2, 0.0  ;;  %v1779_v43 = vsel %vm1715_vm0, %v1491_v55, 0.0  ;;  %v1782_v29 = vsel %vm3077_vm8, %v1494_v30, 0.0  ;;  %v1866_v24 = vsel %vm1865_vm13, %v1286_v57, %v1864_v38  ;;  %v2318_v32 = vpop.f32.mrb[24].mxu1 }
 0x2f9   : > { %v1802_v10 = vmax.f32 %v1800_v21, %v1801_v9  ;;  %v1812_v51 = vmax.f32 %v1781_v52, %v1782_v29  ;;  %v1780_v22 = vsel %vm1732_vm2, %v1492_v40, 0.0  ;;  %v3098_v25 = vsel %vm1867_vm4, %v1293_v59, %v1866_v24  ;;  %v1456_v8 = vpop.f32.mrb[25].mxu1 }
 0x2fa   : > { %v1795_v1 = vmax.f32 %v1793_v62, %v1794_v48  ;;  %v1805_v61 = vmax.f32 %v1779_v43, %v1780_v22  ;;  %v1465_v7 = vadd.f32 %v2318_v32, %v3012_v16  ;;  %v3101_v27 = vand.u32 1, %v819_v41  ;;  %v2319_v6 = vpop.f32.mrb[26].mxu1 }
 0x2fb   : > { %v1803_v42 = vrot.slane %v1802_v10, 1  ;;  %v1813_v14 = vrot.slane %v1812_v51, 4  ;;  %v1457_v15 = vadd.f32 %v3012_v16, %v1456_v8  ;;  %v1628_v18 = vand.u32 1, %v2953_v5  ;;  %v1459_v11 = vpop.f32.mrb[27].mxu1 }
 0x2fc   : > { %v1796_v4 = vrot.slane %v1795_v1, 1  ;;  %v1806_v12 = vrot.slane %v1805_v61, 4  ;;  %v1497_v49 = vmax.f32 %v1465_v7, 0.0  ;;  %v1468_v33 = vadd.f32 %v2319_v6, %v3012_v16 }
 0x2fd   : > { %vm1725_vm0 = vcmp.eq.s32.totalorder %v3088_v23, 0  ;;  %v1804_v34 = vmax.f32 %v1802_v10, %v1803_v42  ;;  %v1814_v50 = vmax.f32 %v1812_v51, %v1813_v14  ;;  %v1495_v3 = vmax.f32 %v1457_v15, 0.0 }
 0x2fe   : > { %v1460_v38 = vadd.f32 %v3012_v16, %v1459_v11  ;;  %v1797_v0 = vmax.f32 %v1795_v1, %v1796_v4  ;;  %v1807_v35 = vmax.f32 %v1805_v61, %v1806_v12  ;;  %v1498_v28 = vmax.f32 %v1468_v33, 0.0 }
 0x2ff   : > { %v1614_v44 = vand.u32 1, %v2955_v53  ;;  %v1815_v45 = vrot.slane %v1814_v50, 2  ;;  %vm1518_vm1 = vcmp.le.s32.totalorder %v2953_v5, 12  ;;  %vm3118_vm8 = vcmp.eq.s32.totalorder %v1628_v18, 0 }
 0x300   : > { %v1496_v17 = vmax.f32 %v1460_v38, 0.0  ;;  %vm3196_vm5 = vcmask 1041409   ;;  %v1808_v20 = vrot.slane %v1807_v35, 2  ;;  %v1785_v37 = vsel %vm1721_vm9, %v1497_v49, 0.0  ;;  %v2322_v2 = vpop.f32.mrb[28].mxu1  ;;  %vm1742_vm7 = vmand %vm1518_vm1, %vm3118_vm8 }
 0x301   : > { %v1878_v58 = vsel %vm3196_vm5, %v1804_v34, %v1797_v0  ;;  %v1786_v19 = vsel %vm1738_vm14, %v1498_v28, 0.0  ;;  %v1816_v54 = vmax.f32 %v1814_v50, %v1815_v45  ;;  %v1783_v60 = vsel %vm1719_vm11, %v1495_v3, 0.0  ;;  %v1472_v55 = vpop.f32.mrb[29].mxu1 }
 0x302   : > { %v1826_v46 = vmax.f32 %v1785_v37, %v1786_v19  ;;  %v1784_v13 = vsel %vm1736_vm15, %v1496_v17, 0.0  ;;  %v1809_v26 = vmax.f32 %v1807_v35, %v1808_v20  ;;  %v1481_v21 = vadd.f32 %v2322_v2, %v3012_v16  ;;  %v2323_v41 = vpop.f32.mrb[30].mxu1  ;;  %v2178_v37 = vld [vmem:[%s3167_s7] ss:$0 sm:$0xff] }
 0x303   : > { %v1819_v47 = vmax.f32 %v1783_v60, %v1784_v13  ;;  %vm1516_vm6 = vcmp.le.s32.totalorder %v2955_v53, 12  ;;  %v1817_v63 = vrot.slane %v1816_v54, 1  ;;  %v1473_v39 = vadd.f32 %v3012_v16, %v1472_v55  ;;  %v1475_v59 = vpop.f32.mrb[31].mxu1 }
 0x304   : > { %v1827_v56 = vrot.slane %v1826_v46, 4  ;;  %vm1724_vm3 = vcmp.eq.s32.totalorder %v1614_v44, 0  ;;  %v1810_v57 = vrot.slane %v1809_v26, 1  ;;  %v1501_v31 = vmax.f32 %v1481_v21, 0.0 }
 0x305   : > { %v1820_v62 = vrot.slane %v1819_v47, 4  ;;  %v1484_v30 = vadd.f32 %v2323_v41, %v3012_v16  ;;  %v1499_v52 = vmax.f32 %v1473_v39, 0.0  ;;  %vm1723_vm11 = vcmp.eq.s32.totalorder %v3101_v27, 0  ;;  %vm1740_vm9 = vmand %vm1516_vm6, %vm1724_vm3 }
 0x306   : > { %v1828_v9 = vmax.f32 %v1826_v46, %v1827_v56  ;;  %v1476_v40 = vadd.f32 %v3012_v16, %v1475_v59  ;;  %v1811_v48 = vmax.f32 %v1809_v26, %v1810_v57  ;;  %v1818_v24 = vmax.f32 %v1816_v54, %v1817_v63 }
 0x307   : > { %v1821_v43 = vmax.f32 %v1819_v47, %v1820_v62  ;;  %v1502_v29 = vmax.f32 %v1484_v30, 0.0  ;;  %v1789_v51 = vsel %vm1725_vm0, %v1501_v31, 0.0  ;;  %vm3197_vm2 = vcmask 1042434  }
 0x308   : > { %v1829_v10 = vrot.slane %v1828_v9, 2  ;;  %v1500_v22 = vmax.f32 %v1476_v40, 0.0  ;;  %v1879_v32 = vsel %vm3197_vm2, %v1811_v48, %v1878_v58  ;;  %v1787_v61 = vsel %vm1723_vm11, %v1499_v52, 0.0 }
 0x309   : > { %v1822_v1 = vrot.slane %v1821_v43, 2  ;;  %v1790_v5 = vsel %vm1742_vm7, %v1502_v29, 0.0  ;;  %vm3198_vm12 = vcmask 1043459   ;;  %vm3199_vm0 = vcmask 1045509  }
 0x30a   : > { %v1830_v7 = vmax.f32 %v1828_v9, %v1829_v10  ;;  %v1840_v8 = vmax.f32 %v1789_v51, %v1790_v5  ;;  %v1788_v16 = vsel %vm1740_vm9, %v1500_v22, 0.0  ;;  %v1880_v27 = vsel %vm3198_vm12, %v1818_v24, %v1879_v32 }
 0x30b   : > { %v1823_v42 = vmax.f32 %v1821_v43, %v1822_v1  ;;  %v1833_v14 = vmax.f32 %v1787_v61, %v1788_v16  ;;  %v1886_v58 = vpack.c.bf16 %v3098_v25, %v3098_v25 }
 0x30c   : > { %v1831_v53 = vrot.slane %v1830_v7, 1  ;;  %v1841_v15 = vrot.slane %v1840_v8, 4 }
 0x30d   : > { %v1824_v6 = vrot.slane %v1823_v42, 1  ;;  %v1834_v18 = vrot.slane %v1833_v14, 4 }
 0x30e   : > { %v1842_v4 = vmax.f32 %v1840_v8, %v1841_v15  ;;  %v1832_v49 = vmax.f32 %v1830_v7, %v1831_v53 }
 0x30f   : > { %v1825_v23 = vmax.f32 %v1823_v42, %v1824_v6  ;;  %v1835_v12 = vmax.f32 %v1833_v14, %v1834_v18 }
 0x310   : > { %v1843_v33 = vrot.slane %v1842_v4, 2 }
 0x311   : > { %v1836_v11 = vrot.slane %v1835_v12, 2  ;;  %v1881_v34 = vsel %vm1861_vm10, %v1825_v23, %v1880_v27 }
 0x312   : > { %v1844_v50 = vmax.f32 %v1842_v4, %v1843_v33  ;;  %v1882_v3 = vsel %vm3199_vm0, %v1832_v49, %v1881_v34 }
 0x313   : > { %v1837_v38 = vmax.f32 %v1835_v12, %v1836_v11 }
 0x314   : > { %v1845_v0 = vrot.slane %v1844_v50, 1 }
 0x315   : > { %v1838_v35 = vrot.slane %v1837_v38, 1 }
 0x316   : > { %v1846_v44 = vmax.f32 %v1844_v50, %v1845_v0 }
 0x317   : > { %v1839_v28 = vmax.f32 %v1837_v38, %v1838_v35 }
 0x319   : > { %v1883_v45 = vsel %vm1865_vm13, %v1839_v28, %v1882_v3 }
 0x31a   : > { %v1884_v17 = vsel %vm1867_vm4, %v1846_v44, %v1883_v45 }
 0x31b   : > { %v1887_v36 = vpack.c.bf16 %v1884_v17, %v1884_v17 }
 0x31d   : > { %2055 = vmatprep.mubr.bf16.mxu0 %v1887_v36 }
 0x31e   : > { %2056 = vmatmul.mubr.bf16.vlgmr.msra.gmra.mrb[16].mxu0 %v1886_v58 }
 0x3f1   : > { %v2248_v20 = vpop.f32.mrb[16].mxu0 }
 0x3f2   : > { %v2249_v19 = vpop.f32.mrb[17].mxu0 }
 0x3f3   : > { %v2250_v54 = vadd.f32 %v2249_v19, %v2248_v20  ;;  %v2251_v60 = vpop.f32.mrb[18].mxu0 }
 0x3f4   : > { %v2252_v46 = vpop.f32.mrb[19].mxu0 }
 0x3f5   : > { %v2058_v13 = vadd.f32 %v2250_v54, %v2178_v37 }
 0x3f7   : > { %2063 = vst [vmem:[%s305_s18] sm:$0xff] %v2058_v13 }
 0x3f8 PF: > { %s18_s27 = sadd.s32 1, %s2373_s27  }
 0x3f9   : > { %p15_p5 = scmp.ge.s32.totalorder %s18_s27, 4  }
 0x3fb   :  { %17 = sbr.rel (!%p15_p5) target bundleno = 1 (0x1), region = 82 }

</bundles_post_ra>
